<compile_context>
chip_gen: v7x
topology: tpu7x:2x2x1
jax: 0.10.0
libtpu: 0.0.40
codegen_flags: <defaults>
</compile_context>

<pallas_src>
import math
import jax
import jax.numpy as jnp
from jax.experimental import pallas as pl
from jax.experimental.pallas import tpu as pltpu


# ----------------------------------------------------------------------------
# Config (small synthetic DistilBERT)
# ----------------------------------------------------------------------------
class Cfg:
    vocab = 100
    vocab_pad = 128      # word-emb table padded to a lane multiple for the one-hot matmul
    max_pos = 16
    H = 32               # hidden size
    n_heads = 4
    head_dim = H // n_heads
    ffn = 64             # intermediate size (4*H in real DistilBERT)
    n_layers = 2
    num_classes = 3
    ln_eps = 1e-12


NEG = -1e9               # finite additive mask value (avoids -inf intermediates)

LAYER_KEYS = ("qkv_w", "qkv_b", "o_w", "o_b", "sa_ln_g", "sa_ln_b",
              "ffn1_w", "ffn1_b", "ffn2_w", "ffn2_b", "out_ln_g", "out_ln_b")


def _layernorm(h, g, b, eps):
    mu = jnp.mean(h, axis=-1, keepdims=True)
    var = jnp.mean((h - mu) * (h - mu), axis=-1, keepdims=True)
    return (h - mu) * jax.lax.rsqrt(var + eps) * g + b


def _const_spec(arr):
    """Whole-array block, constant block index (weights / tables / biases)."""
    nd = arr.ndim
    return pl.BlockSpec(arr.shape, lambda b, _nd=nd: (0,) * _nd)


# ----------------------------------------------------------------------------
# Fully fused forward kernel (one sequence per grid step)
# ----------------------------------------------------------------------------
def make_fused_kernel(S, cfg):
    H, nh, dh = cfg.H, cfg.n_heads, cfg.head_dim
    Vp, nl, eps = cfg.vocab_pad, cfg.n_layers, cfg.ln_eps

    def kernel(*refs):
        ids_ref, mask_ref, wemb_ref, pos_ref, g_emb_ref, b_emb_ref = refs[:6]
        layer_refs = refs[6:6 + 12 * nl]
        wcls_ref, bcls_ref = refs[6 + 12 * nl:8 + 12 * nl]
        out_ref = refs[-1]

        # ---- embedding: one-hot gather on the MXU + position add + LayerNorm ----
        ids = ids_ref[...]                                              # [S, 1] int32
        onehot = (ids == jax.lax.broadcasted_iota(jnp.int32, (S, Vp), 1)
                  ).astype(jnp.float32)                                 # [S, Vp]
        x = jnp.dot(onehot, wemb_ref[...],
                    preferred_element_type=jnp.float32)                 # [S, H]
        x = x + pos_ref[0:S, :]
        x = _layernorm(x, g_emb_ref[...], b_emb_ref[...], eps)
        # embeddings Dropout(0.1): identity in eval mode.

        # ---- key-padding additive bias (hoisted: shared by all layers & heads) ----
        kbias = jnp.where(mask_ref[...] > 0, 0.0, NEG)[None]            # [1, 1, S]

        for l in range(nl):
            (wqkv, bqkv, wo, bo, g1, be1, w1, bb1,
             w2, bb2, g2, be2) = layer_refs[12 * l:12 * (l + 1)]

            # packed QKV matmul (query 1/sqrt(dh) folded into Q columns at init)
            qkv = jnp.dot(x, wqkv[...],
                          preferred_element_type=jnp.float32) + bqkv[...]   # [S, 3H]

            # heads stacked on a leading axis -> batched attention, single softmax
            q = jnp.stack([qkv[:, h * dh:(h + 1) * dh]
                           for h in range(nh)], axis=0)                     # [nh, S, dh]
            k = jnp.stack([qkv[:, H + h * dh:H + (h + 1) * dh]
                           for h in range(nh)], axis=0)
            v = jnp.stack([qkv[:, 2 * H + h * dh:2 * H + (h + 1) * dh]
                           for h in range(nh)], axis=0)

            s = jnp.einsum("hqd,hkd->hqk", q, k,
                           preferred_element_type=jnp.float32) + kbias      # [nh, S, S]
            smax = jnp.max(s, axis=-1, keepdims=True)
            e = jnp.exp(s - smax)
            p = e * pl.reciprocal(jnp.sum(e, axis=-1, keepdims=True), approx=True)
            # attention-prob Dropout(0.1): identity in eval mode.
            ctx = jnp.einsum("hqk,hkd->hqd", p, v,
                             preferred_element_type=jnp.float32)            # [nh, S, dh]

            # re-interleave heads into contiguous columns -> ONE output projection
            ctx2 = jnp.concatenate([ctx[h] for h in range(nh)], axis=1)     # [S, H]
            attn = jnp.dot(ctx2, wo[...],
                           preferred_element_type=jnp.float32) + bo[...]
            x = _layernorm(attn + x, g1[...], be1[...], eps)

            # FFN. TODO(synk): HF DistilBERT uses exact erf-GELU; tanh-approx GELU
            # is used for robust Mosaic lowering (~1e-3 numerics difference).
            f = jnp.dot(x, w1[...], preferred_element_type=jnp.float32) + bb1[...]
            f = jax.nn.gelu(f, approximate=True)
            f = jnp.dot(f, w2[...], preferred_element_type=jnp.float32) + bb2[...]
            # FFN Dropout(0.1): identity in eval mode.
            x = _layernorm(f + x, g2[...], be2[...], eps)

        # ---- CLS pooling + Dropout(identity) + classifier, still in VMEM ----
        cls = x[0:1, :]                                                     # [1, H]
        logits = jnp.dot(cls, wcls_ref[...],
                         preferred_element_type=jnp.float32) + bcls_ref[...]
        out_ref[...] = logits.astype(out_ref.dtype)

    return kernel


# ----------------------------------------------------------------------------
# Forward wrapper: ONE pallas_call for the whole model
# ----------------------------------------------------------------------------
def distilbert_baseline_forward(params, input_ids, attention_mask):
    cfg = Cfg
    B, S = input_ids.shape
    C = cfg.num_classes

    ids3 = input_ids.astype(jnp.int32).reshape(B, S, 1)        # in-kernel one-hot gather
    mask3 = attention_mask.astype(jnp.int32).reshape(B, 1, S)  # key-padding mask

    args = [ids3, mask3, params["word_emb"], params["pos_emb"],
            params["emb_ln_g"], params["emb_ln_b"]]
    in_specs = [
        pl.BlockSpec((None, S, 1), lambda b: (b, 0, 0)),   # ids, per sequence
        pl.BlockSpec((None, 1, S), lambda b: (b, 0, 0)),   # mask, per sequence
        _const_spec(params["word_emb"]),
        _const_spec(params["pos_emb"]),
        _const_spec(params["emb_ln_g"]),
        _const_spec(params["emb_ln_b"]),
    ]
    for lyr in params["layers"]:
        for key in LAYER_KEYS:
            args.append(lyr[key])
            in_specs.append(_const_spec(lyr[key]))
    args += [params["cls_w"], params["cls_b"]]
    in_specs += [_const_spec(params["cls_w"]), _const_spec(params["cls_b"])]

    # rough advisory cost so XLA schedules the custom call sensibly
    flops = B * (2 * S * cfg.vocab_pad * cfg.H
                 + cfg.n_layers * (2 * S * cfg.H * 3 * cfg.H
                                   + 4 * cfg.n_heads * S * S * cfg.head_dim
                                   + 2 * S * cfg.H * cfg.H
                                   + 4 * S * cfg.H * cfg.ffn)
                 + 2 * cfg.H * C)
    transcendentals = B * cfg.n_layers * (cfg.n_heads * S * S + S * cfg.ffn)
    bytes_accessed = 4 * (sum(int(a.size) for a in args) + B * C)

    out = pl.pallas_call(
        make_fused_kernel(S, cfg),
        out_shape=jax.ShapeDtypeStruct((B, 1, C), jnp.float32),
        grid=(B,),
        in_specs=in_specs,
        out_specs=pl.BlockSpec((None, 1, C), lambda b: (b, 0, 0)),
        compiler_params=pltpu.CompilerParams(dimension_semantics=("parallel",)),
        cost_estimate=pl.CostEstimate(flops=flops,
                                      transcendentals=transcendentals,
                                      bytes_accessed=bytes_accessed),
    )(*args)
    return out.reshape(B, C)


# ----------------------------------------------------------------------------
# Parameters (deterministic synthetic init; Linear weights stored [in, out] so
# the kernel does plain x @ W; Q/K/V packed into one [H, 3H] weight with the
# 1/sqrt(head_dim) query scale folded into the Q columns)
# ----------------------------------------------------------------------------
def init_params(key):
    cfg = Cfg
    keys = list(jax.random.split(key, 4 + 6 * cfg.n_layers))
    kit = iter(keys)

    def dense(k, din, dout):
        w = jax.random.normal(k, (din, dout), jnp.float32) * 0.02
        b = jnp.zeros((1, dout), jnp.float32)
        return w, b

    scale = 1.0 / math.sqrt(cfg.head_dim)

    p = {}
    wemb = jax.random.normal(next(kit), (cfg.vocab, cfg.H), jnp.float32) * 0.02
    # pad the table to 128 rows so the in-kernel one-hot gather matmul is lane-aligned
    p["word_emb"] = jnp.concatenate(
        [wemb, jnp.zeros((cfg.vocab_pad - cfg.vocab, cfg.H), jnp.float32)], axis=0)
    p["pos_emb"] = jax.random.normal(next(kit), (cfg.max_pos, cfg.H), jnp.float32) * 0.02
    p["emb_ln_g"] = jnp.ones((1, cfg.H), jnp.float32)
    p["emb_ln_b"] = jnp.zeros((1, cfg.H), jnp.float32)

    layers = []
    for _ in range(cfg.n_layers):
        lyr = {}
        wq, bq = dense(next(kit), cfg.H, cfg.H)
        wk, bk = dense(next(kit), cfg.H, cfg.H)
        wv, bv = dense(next(kit), cfg.H, cfg.H)
        # packed QKV with the query scale folded in (identical to DistilBERT's
        # q / sqrt(head_dim) applied before the score matmul)
        lyr["qkv_w"] = jnp.concatenate([wq * scale, wk, wv], axis=1)   # [H, 3H]
        lyr["qkv_b"] = jnp.concatenate([bq * scale, bk, bv], axis=1)   # [1, 3H]
        lyr["o_w"], lyr["o_b"] = dense(next(kit), cfg.H, cfg.H)
        lyr["sa_ln_g"] = jnp.ones((1, cfg.H), jnp.float32)
        lyr["sa_ln_b"] = jnp.zeros((1, cfg.H), jnp.float32)
        lyr["ffn1_w"], lyr["ffn1_b"] = dense(next(kit), cfg.H, cfg.ffn)
        lyr["ffn2_w"], lyr["ffn2_b"] = dense(next(kit), cfg.ffn, cfg.H)
        lyr["out_ln_g"] = jnp.ones((1, cfg.H), jnp.float32)
        lyr["out_ln_b"] = jnp.zeros((1, cfg.H), jnp.float32)
        layers.append(lyr)
    p["layers"] = layers

    p["cls_w"], p["cls_b"] = dense(next(kit), cfg.H, cfg.num_classes)
    return p


# ----------------------------------------------------------------------------
if __name__ == "__main__":
    key = jax.random.PRNGKey(0)
    k_params, k_ids = jax.random.split(key)

    params = init_params(k_params)

    B, S = 2, 8
    input_ids = jax.random.randint(k_ids, (B, S), 0, Cfg.vocab, dtype=jnp.int32)
    # second sequence has 2 padding tokens at the end
    attention_mask = jnp.array(
        [[1, 1, 1, 1, 1, 1, 1, 1],
         [1, 1, 1, 1, 1, 1, 0, 0]], dtype=jnp.int32)

    fwd = jax.jit(distilbert_baseline_forward)
    logits = fwd(params, input_ids, attention_mask)
    jax.block_until_ready(logits)

    assert logits.shape == (B, Cfg.num_classes)
    assert logits.dtype == jnp.float32
    assert bool(jnp.all(jnp.isfinite(logits)))
    print("KERNEL_OK")
</pallas_src>

<mosaic_0001>
module attributes {stable_mosaic.version = 11 : i64} {
  func.func @kernel(%arg0: i32, %arg1: memref<1x8x1xi32, #tpu.memory_space<vmem>>, %arg2: memref<1x1x8xi32, #tpu.memory_space<vmem>>, %arg3: memref<128x32xf32, #tpu.memory_space<vmem>>, %arg4: memref<16x32xf32, #tpu.memory_space<vmem>>, %arg5: memref<1x32xf32, #tpu.memory_space<vmem>>, %arg6: memref<1x32xf32, #tpu.memory_space<vmem>>, %arg7: memref<32x96xf32, #tpu.memory_space<vmem>>, %arg8: memref<1x96xf32, #tpu.memory_space<vmem>>, %arg9: memref<32x32xf32, #tpu.memory_space<vmem>>, %arg10: memref<1x32xf32, #tpu.memory_space<vmem>>, %arg11: memref<1x32xf32, #tpu.memory_space<vmem>>, %arg12: memref<1x32xf32, #tpu.memory_space<vmem>>, %arg13: memref<32x64xf32, #tpu.memory_space<vmem>>, %arg14: memref<1x64xf32, #tpu.memory_space<vmem>>, %arg15: memref<64x32xf32, #tpu.memory_space<vmem>>, %arg16: memref<1x32xf32, #tpu.memory_space<vmem>>, %arg17: memref<1x32xf32, #tpu.memory_space<vmem>>, %arg18: memref<1x32xf32, #tpu.memory_space<vmem>>, %arg19: memref<32x96xf32, #tpu.memory_space<vmem>>, %arg20: memref<1x96xf32, #tpu.memory_space<vmem>>, %arg21: memref<32x32xf32, #tpu.memory_space<vmem>>, %arg22: memref<1x32xf32, #tpu.memory_space<vmem>>, %arg23: memref<1x32xf32, #tpu.memory_space<vmem>>, %arg24: memref<1x32xf32, #tpu.memory_space<vmem>>, %arg25: memref<32x64xf32, #tpu.memory_space<vmem>>, %arg26: memref<1x64xf32, #tpu.memory_space<vmem>>, %arg27: memref<64x32xf32, #tpu.memory_space<vmem>>, %arg28: memref<1x32xf32, #tpu.memory_space<vmem>>, %arg29: memref<1x32xf32, #tpu.memory_space<vmem>>, %arg30: memref<1x32xf32, #tpu.memory_space<vmem>>, %arg31: memref<32x3xf32, #tpu.memory_space<vmem>>, %arg32: memref<1x3xf32, #tpu.memory_space<vmem>>, %arg33: memref<1x1x3xf32, #tpu.memory_space<vmem>>) attributes {dimension_semantics = [#tpu.dimension_semantics<parallel>], iteration_bounds = array<i64: 2>, scalar_prefetch = 0 : i64, scratch_operands = 0 : i64, tpu.core_type = #tpu.core_type<tc>, window_params = [{transform_indices = @transform_0, window_bounds = array<i64: 1, 8, 1>}, {transform_indices = @transform_1, window_bounds = array<i64: 1, 1, 8>}, {pipeline_mode = #tpu.pipeline_mode<synchronous>, transform_indices = @transform_2, window_bounds = array<i64: 128, 32>}, {pipeline_mode = #tpu.pipeline_mode<synchronous>, transform_indices = @transform_3, window_bounds = array<i64: 16, 32>}, {pipeline_mode = #tpu.pipeline_mode<synchronous>, transform_indices = @transform_4, window_bounds = array<i64: 1, 32>}, {pipeline_mode = #tpu.pipeline_mode<synchronous>, transform_indices = @transform_5, window_bounds = array<i64: 1, 32>}, {pipeline_mode = #tpu.pipeline_mode<synchronous>, transform_indices = @transform_6, window_bounds = array<i64: 32, 96>}, {pipeline_mode = #tpu.pipeline_mode<synchronous>, transform_indices = @transform_7, window_bounds = array<i64: 1, 96>}, {pipeline_mode = #tpu.pipeline_mode<synchronous>, transform_indices = @transform_8, window_bounds = array<i64: 32, 32>}, {pipeline_mode = #tpu.pipeline_mode<synchronous>, transform_indices = @transform_9, window_bounds = array<i64: 1, 32>}, {pipeline_mode = #tpu.pipeline_mode<synchronous>, transform_indices = @transform_10, window_bounds = array<i64: 1, 32>}, {pipeline_mode = #tpu.pipeline_mode<synchronous>, transform_indices = @transform_11, window_bounds = array<i64: 1, 32>}, {pipeline_mode = #tpu.pipeline_mode<synchronous>, transform_indices = @transform_12, window_bounds = array<i64: 32, 64>}, {pipeline_mode = #tpu.pipeline_mode<synchronous>, transform_indices = @transform_13, window_bounds = array<i64: 1, 64>}, {pipeline_mode = #tpu.pipeline_mode<synchronous>, transform_indices = @transform_14, window_bounds = array<i64: 64, 32>}, {pipeline_mode = #tpu.pipeline_mode<synchronous>, transform_indices = @transform_15, window_bounds = array<i64: 1, 32>}, {pipeline_mode = #tpu.pipeline_mode<synchronous>, transform_indices = @transform_16, window_bounds = array<i64: 1, 32>}, {pipeline_mode = #tpu.pipeline_mode<synchronous>, transform_indices = @transform_17, window_bounds = array<i64: 1, 32>}, {pipeline_mode = #tpu.pipeline_mode<synchronous>, transform_indices = @transform_18, window_bounds = array<i64: 32, 96>}, {pipeline_mode = #tpu.pipeline_mode<synchronous>, transform_indices = @transform_19, window_bounds = array<i64: 1, 96>}, {pipeline_mode = #tpu.pipeline_mode<synchronous>, transform_indices = @transform_20, window_bounds = array<i64: 32, 32>}, {pipeline_mode = #tpu.pipeline_mode<synchronous>, transform_indices = @transform_21, window_bounds = array<i64: 1, 32>}, {pipeline_mode = #tpu.pipeline_mode<synchronous>, transform_indices = @transform_22, window_bounds = array<i64: 1, 32>}, {pipeline_mode = #tpu.pipeline_mode<synchronous>, transform_indices = @transform_23, window_bounds = array<i64: 1, 32>}, {pipeline_mode = #tpu.pipeline_mode<synchronous>, transform_indices = @transform_24, window_bounds = array<i64: 32, 64>}, {pipeline_mode = #tpu.pipeline_mode<synchronous>, transform_indices = @transform_25, window_bounds = array<i64: 1, 64>}, {pipeline_mode = #tpu.pipeline_mode<synchronous>, transform_indices = @transform_26, window_bounds = array<i64: 64, 32>}, {pipeline_mode = #tpu.pipeline_mode<synchronous>, transform_indices = @transform_27, window_bounds = array<i64: 1, 32>}, {pipeline_mode = #tpu.pipeline_mode<synchronous>, transform_indices = @transform_28, window_bounds = array<i64: 1, 32>}, {pipeline_mode = #tpu.pipeline_mode<synchronous>, transform_indices = @transform_29, window_bounds = array<i64: 1, 32>}, {pipeline_mode = #tpu.pipeline_mode<synchronous>, transform_indices = @transform_30, window_bounds = array<i64: 32, 3>}, {pipeline_mode = #tpu.pipeline_mode<synchronous>, transform_indices = @transform_31, window_bounds = array<i64: 1, 3>}, {transform_indices = @transform_32, window_bounds = array<i64: 1, 1, 3>}]} {
    %c0 = arith.constant 0 : index
    %c0_0 = arith.constant 0 : index
    %c0_1 = arith.constant 0 : index
    %0 = vector.load %arg1[%c0, %c0_0, %c0_1] : memref<1x8x1xi32, #tpu.memory_space<vmem>>, vector<1x8x1xi32>
    %1 = vector.shape_cast %0 : vector<1x8x1xi32> to vector<8x1xi32>
    %2 = tpu.iota {dimensions = array<i32: 1>} : vector<8x128xi32>
    %3 = vector.broadcast %1 : vector<8x1xi32> to vector<8x128xi32>
    %4 = arith.cmpi eq, %3, %2 : vector<8x128xi32>
    %5 = arith.extui %4 : vector<8x128xi1> to vector<8x128xi32>
    %6 = arith.sitofp %5 : vector<8x128xi32> to vector<8x128xf32>
    %c0_2 = arith.constant 0 : index
    %c0_3 = arith.constant 0 : index
    %7 = vector.load %arg3[%c0_2, %c0_3] : memref<128x32xf32, #tpu.memory_space<vmem>>, vector<128x32xf32>
    %cst = arith.constant dense<0.000000e+00> : vector<8x32xf32>
    %8 = tpu.matmul %6, %7, %cst {dimension_numbers = #tpu.dot_dimension_numbers<[1], [0], [0], [1], [0, 0, 1, 1], [], []>} : vector<8x128xf32>, vector<128x32xf32>, vector<8x32xf32> -> vector<8x32xf32>
    %c0_4 = arith.constant 0 : index
    %c0_5 = arith.constant 0 : index
    %9 = vector.load %arg4[%c0_4, %c0_5] : memref<16x32xf32, #tpu.memory_space<vmem>>, vector<8x32xf32>
    %10 = arith.addf %8, %9 : vector<8x32xf32>
    %c0_6 = arith.constant 0 : index
    %c0_7 = arith.constant 0 : index
    %11 = vector.load %arg5[%c0_6, %c0_7] : memref<1x32xf32, #tpu.memory_space<vmem>>, vector<1x32xf32>
    %c0_8 = arith.constant 0 : index
    %c0_9 = arith.constant 0 : index
    %12 = vector.load %arg6[%c0_8, %c0_9] : memref<1x32xf32, #tpu.memory_space<vmem>>, vector<1x32xf32>
    %cst_10 = arith.constant dense<0.000000e+00> : vector<8xf32>
    %13 = vector.multi_reduction <add>, %10, %cst_10 [1] : vector<8x32xf32> to vector<8xf32>
    %14 = vector.shape_cast %13 : vector<8xf32> to vector<8x1xf32>
    %cst_11 = arith.constant 3.200000e+01 : f32
    %15 = vector.broadcast %cst_11 : f32 to vector<8x1xf32>
    %16 = arith.divf %14, %15 : vector<8x1xf32>
    %17 = vector.broadcast %16 : vector<8x1xf32> to vector<8x32xf32>
    %18 = arith.subf %10, %17 : vector<8x32xf32>
    %19 = vector.broadcast %16 : vector<8x1xf32> to vector<8x32xf32>
    %20 = arith.subf %10, %19 : vector<8x32xf32>
    %21 = arith.mulf %18, %20 : vector<8x32xf32>
    %cst_12 = arith.constant dense<0.000000e+00> : vector<8xf32>
    %22 = vector.multi_reduction <add>, %21, %cst_12 [1] : vector<8x32xf32> to vector<8xf32>
    %23 = vector.shape_cast %22 : vector<8xf32> to vector<8x1xf32>
    %cst_13 = arith.constant 3.200000e+01 : f32
    %24 = vector.broadcast %cst_13 : f32 to vector<8x1xf32>
    %25 = arith.divf %23, %24 : vector<8x1xf32>
    %26 = vector.broadcast %16 : vector<8x1xf32> to vector<8x32xf32>
    %27 = arith.subf %10, %26 : vector<8x32xf32>
    %cst_14 = arith.constant 9.99999996E-13 : f32
    %28 = vector.broadcast %cst_14 : f32 to vector<8x1xf32>
    %29 = arith.addf %25, %28 : vector<8x1xf32>
    %30 = math.rsqrt %29 : vector<8x1xf32>
    %31 = vector.broadcast %30 : vector<8x1xf32> to vector<8x32xf32>
    %32 = arith.mulf %27, %31 : vector<8x32xf32>
    %33 = vector.broadcast %11 : vector<1x32xf32> to vector<8x32xf32>
    %34 = arith.mulf %32, %33 : vector<8x32xf32>
    %35 = vector.broadcast %12 : vector<1x32xf32> to vector<8x32xf32>
    %36 = arith.addf %34, %35 : vector<8x32xf32>
    %c0_15 = arith.constant 0 : index
    %c0_16 = arith.constant 0 : index
    %c0_17 = arith.constant 0 : index
    %37 = vector.load %arg2[%c0_15, %c0_16, %c0_17] : memref<1x1x8xi32, #tpu.memory_space<vmem>>, vector<1x1x8xi32>
    %38 = vector.shape_cast %37 : vector<1x1x8xi32> to vector<1x8xi32>
    %c0_i32 = arith.constant 0 : i32
    %39 = vector.broadcast %c0_i32 : i32 to vector<1x8xi32>
    %40 = arith.cmpi sgt, %38, %39 : vector<1x8xi32>
    %cst_18 = arith.constant 0.000000e+00 : f32
    %cst_19 = arith.constant -1.000000e+09 : f32
    %41 = vector.broadcast %cst_18 : f32 to vector<1x8xf32>
    %42 = vector.broadcast %cst_19 : f32 to vector<1x8xf32>
    %43 = arith.select %40, %41, %42 : vector<1x8xi1>, vector<1x8xf32>
    %44 = vector.shape_cast %43 : vector<1x8xf32> to vector<1x1x8xf32>
    %c0_20 = arith.constant 0 : index
    %c0_21 = arith.constant 0 : index
    %45 = vector.load %arg7[%c0_20, %c0_21] : memref<32x96xf32, #tpu.memory_space<vmem>>, vector<32x96xf32>
    %cst_22 = arith.constant dense<0.000000e+00> : vector<8x96xf32>
    %46 = tpu.matmul %36, %45, %cst_22 {dimension_numbers = #tpu.dot_dimension_numbers<[1], [0], [0], [1], [0, 0, 1, 1], [], []>} : vector<8x32xf32>, vector<32x96xf32>, vector<8x96xf32> -> vector<8x96xf32>
    %c0_23 = arith.constant 0 : index
    %c0_24 = arith.constant 0 : index
    %47 = vector.load %arg8[%c0_23, %c0_24] : memref<1x96xf32, #tpu.memory_space<vmem>>, vector<1x96xf32>
    %48 = vector.broadcast %47 : vector<1x96xf32> to vector<8x96xf32>
    %49 = arith.addf %46, %48 : vector<8x96xf32>
    %50 = vector.extract_strided_slice %49 {offsets = [0, 0], sizes = [8, 8], strides = [1, 1]} : vector<8x96xf32> to vector<8x8xf32>
    %51 = vector.extract_strided_slice %49 {offsets = [0, 8], sizes = [8, 8], strides = [1, 1]} : vector<8x96xf32> to vector<8x8xf32>
    %52 = vector.extract_strided_slice %49 {offsets = [0, 16], sizes = [8, 8], strides = [1, 1]} : vector<8x96xf32> to vector<8x8xf32>
    %53 = vector.extract_strided_slice %49 {offsets = [0, 24], sizes = [8, 8], strides = [1, 1]} : vector<8x96xf32> to vector<8x8xf32>
    %54 = vector.shape_cast %50 : vector<8x8xf32> to vector<1x8x8xf32>
    %55 = vector.shape_cast %51 : vector<8x8xf32> to vector<1x8x8xf32>
    %56 = vector.shape_cast %52 : vector<8x8xf32> to vector<1x8x8xf32>
    %57 = vector.shape_cast %53 : vector<8x8xf32> to vector<1x8x8xf32>
    %58 = tpu.concatenate %54, %55, %56, %57 in 0 : vector<1x8x8xf32>, vector<1x8x8xf32>, vector<1x8x8xf32>, vector<1x8x8xf32> -> vector<4x8x8xf32>
    %59 = vector.extract_strided_slice %49 {offsets = [0, 32], sizes = [8, 8], strides = [1, 1]} : vector<8x96xf32> to vector<8x8xf32>
    %60 = vector.extract_strided_slice %49 {offsets = [0, 40], sizes = [8, 8], strides = [1, 1]} : vector<8x96xf32> to vector<8x8xf32>
    %61 = vector.extract_strided_slice %49 {offsets = [0, 48], sizes = [8, 8], strides = [1, 1]} : vector<8x96xf32> to vector<8x8xf32>
    %62 = vector.extract_strided_slice %49 {offsets = [0, 56], sizes = [8, 8], strides = [1, 1]} : vector<8x96xf32> to vector<8x8xf32>
    %63 = vector.shape_cast %59 : vector<8x8xf32> to vector<1x8x8xf32>
    %64 = vector.shape_cast %60 : vector<8x8xf32> to vector<1x8x8xf32>
    %65 = vector.shape_cast %61 : vector<8x8xf32> to vector<1x8x8xf32>
    %66 = vector.shape_cast %62 : vector<8x8xf32> to vector<1x8x8xf32>
    %67 = tpu.concatenate %63, %64, %65, %66 in 0 : vector<1x8x8xf32>, vector<1x8x8xf32>, vector<1x8x8xf32>, vector<1x8x8xf32> -> vector<4x8x8xf32>
    %68 = vector.extract_strided_slice %49 {offsets = [0, 64], sizes = [8, 8], strides = [1, 1]} : vector<8x96xf32> to vector<8x8xf32>
    %69 = vector.extract_strided_slice %49 {offsets = [0, 72], sizes = [8, 8], strides = [1, 1]} : vector<8x96xf32> to vector<8x8xf32>
    %70 = vector.extract_strided_slice %49 {offsets = [0, 80], sizes = [8, 8], strides = [1, 1]} : vector<8x96xf32> to vector<8x8xf32>
    %71 = vector.extract_strided_slice %49 {offsets = [0, 88], sizes = [8, 8], strides = [1, 1]} : vector<8x96xf32> to vector<8x8xf32>
    %72 = vector.shape_cast %68 : vector<8x8xf32> to vector<1x8x8xf32>
    %73 = vector.shape_cast %69 : vector<8x8xf32> to vector<1x8x8xf32>
    %74 = vector.shape_cast %70 : vector<8x8xf32> to vector<1x8x8xf32>
    %75 = vector.shape_cast %71 : vector<8x8xf32> to vector<1x8x8xf32>
    %76 = tpu.concatenate %72, %73, %74, %75 in 0 : vector<1x8x8xf32>, vector<1x8x8xf32>, vector<1x8x8xf32>, vector<1x8x8xf32> -> vector<4x8x8xf32>
    "tpu.trace_start"() <{level = 10 : i32, message = "hqd,hkd->hqk"}> : () -> ()
    %cst_25 = arith.constant dense<0.000000e+00> : vector<4x8x8xf32>
    %77 = tpu.matmul %58, %67, %cst_25 {dimension_numbers = #tpu.dot_dimension_numbers<[2], [2], [1], [1], [0, 0, 0, 1, 1, 1], [0], [0]>} : vector<4x8x8xf32>, vector<4x8x8xf32>, vector<4x8x8xf32> -> vector<4x8x8xf32>
    "tpu.trace_stop"() : () -> ()
    %78 = vector.broadcast %44 : vector<1x1x8xf32> to vector<4x8x8xf32>
    %79 = arith.addf %77, %78 : vector<4x8x8xf32>
    %cst_26 = arith.constant dense<0xFF800000> : vector<4x8xf32>
    %80 = vector.multi_reduction <maximumf>, %79, %cst_26 [2] : vector<4x8x8xf32> to vector<4x8xf32>
    %81 = vector.shape_cast %80 : vector<4x8xf32> to vector<4x8x1xf32>
    %82 = vector.broadcast %81 : vector<4x8x1xf32> to vector<4x8x8xf32>
    %83 = arith.subf %79, %82 : vector<4x8x8xf32>
    %84 = math.exp %83 : vector<4x8x8xf32>
    %cst_27 = arith.constant dense<0.000000e+00> : vector<4x8xf32>
    %85 = vector.multi_reduction <add>, %84, %cst_27 [2] : vector<4x8x8xf32> to vector<4x8xf32>
    %86 = vector.shape_cast %85 : vector<4x8xf32> to vector<4x8x1xf32>
    %87 = tpu.reciprocal %86 {approx = true} : vector<4x8x1xf32> -> vector<4x8x1xf32>
    %88 = vector.broadcast %87 : vector<4x8x1xf32> to vector<4x8x8xf32>
    %89 = arith.mulf %84, %88 : vector<4x8x8xf32>
    "tpu.trace_start"() <{level = 10 : i32, message = "hqk,hkd->hqd"}> : () -> ()
    %cst_28 = arith.constant dense<0.000000e+00> : vector<4x8x8xf32>
    %90 = tpu.matmul %89, %76, %cst_28 {dimension_numbers = #tpu.dot_dimension_numbers<[2], [1], [1], [2], [0, 0, 0, 1, 1, 2], [0], [0]>} : vector<4x8x8xf32>, vector<4x8x8xf32>, vector<4x8x8xf32> -> vector<4x8x8xf32>
    "tpu.trace_stop"() : () -> ()
    %91 = vector.extract_strided_slice %90 {offsets = [0, 0, 0], sizes = [1, 8, 8], strides = [1, 1, 1]} : vector<4x8x8xf32> to vector<1x8x8xf32>
    %92 = vector.shape_cast %91 : vector<1x8x8xf32> to vector<8x8xf32>
    %93 = vector.extract_strided_slice %90 {offsets = [1, 0, 0], sizes = [1, 8, 8], strides = [1, 1, 1]} : vector<4x8x8xf32> to vector<1x8x8xf32>
    %94 = vector.shape_cast %93 : vector<1x8x8xf32> to vector<8x8xf32>
    %95 = vector.extract_strided_slice %90 {offsets = [2, 0, 0], sizes = [1, 8, 8], strides = [1, 1, 1]} : vector<4x8x8xf32> to vector<1x8x8xf32>
    %96 = vector.shape_cast %95 : vector<1x8x8xf32> to vector<8x8xf32>
    %97 = vector.extract_strided_slice %90 {offsets = [3, 0, 0], sizes = [1, 8, 8], strides = [1, 1, 1]} : vector<4x8x8xf32> to vector<1x8x8xf32>
    %98 = vector.shape_cast %97 : vector<1x8x8xf32> to vector<8x8xf32>
    %99 = tpu.concatenate %92, %94, %96, %98 in 1 : vector<8x8xf32>, vector<8x8xf32>, vector<8x8xf32>, vector<8x8xf32> -> vector<8x32xf32>
    %c0_29 = arith.constant 0 : index
    %c0_30 = arith.constant 0 : index
    %100 = vector.load %arg9[%c0_29, %c0_30] : memref<32x32xf32, #tpu.memory_space<vmem>>, vector<32x32xf32>
    %cst_31 = arith.constant dense<0.000000e+00> : vector<8x32xf32>
    %101 = tpu.matmul %99, %100, %cst_31 {dimension_numbers = #tpu.dot_dimension_numbers<[1], [0], [0], [1], [0, 0, 1, 1], [], []>} : vector<8x32xf32>, vector<32x32xf32>, vector<8x32xf32> -> vector<8x32xf32>
    %c0_32 = arith.constant 0 : index
    %c0_33 = arith.constant 0 : index
    %102 = vector.load %arg10[%c0_32, %c0_33] : memref<1x32xf32, #tpu.memory_space<vmem>>, vector<1x32xf32>
    %103 = vector.broadcast %102 : vector<1x32xf32> to vector<8x32xf32>
    %104 = arith.addf %101, %103 : vector<8x32xf32>
    %105 = arith.addf %104, %36 : vector<8x32xf32>
    %c0_34 = arith.constant 0 : index
    %c0_35 = arith.constant 0 : index
    %106 = vector.load %arg11[%c0_34, %c0_35] : memref<1x32xf32, #tpu.memory_space<vmem>>, vector<1x32xf32>
    %c0_36 = arith.constant 0 : index
    %c0_37 = arith.constant 0 : index
    %107 = vector.load %arg12[%c0_36, %c0_37] : memref<1x32xf32, #tpu.memory_space<vmem>>, vector<1x32xf32>
    %cst_38 = arith.constant dense<0.000000e+00> : vector<8xf32>
    %108 = vector.multi_reduction <add>, %105, %cst_38 [1] : vector<8x32xf32> to vector<8xf32>
    %109 = vector.shape_cast %108 : vector<8xf32> to vector<8x1xf32>
    %cst_39 = arith.constant 3.200000e+01 : f32
    %110 = vector.broadcast %cst_39 : f32 to vector<8x1xf32>
    %111 = arith.divf %109, %110 : vector<8x1xf32>
    %112 = vector.broadcast %111 : vector<8x1xf32> to vector<8x32xf32>
    %113 = arith.subf %105, %112 : vector<8x32xf32>
    %114 = vector.broadcast %111 : vector<8x1xf32> to vector<8x32xf32>
    %115 = arith.subf %105, %114 : vector<8x32xf32>
    %116 = arith.mulf %113, %115 : vector<8x32xf32>
    %cst_40 = arith.constant dense<0.000000e+00> : vector<8xf32>
    %117 = vector.multi_reduction <add>, %116, %cst_40 [1] : vector<8x32xf32> to vector<8xf32>
    %118 = vector.shape_cast %117 : vector<8xf32> to vector<8x1xf32>
    %cst_41 = arith.constant 3.200000e+01 : f32
    %119 = vector.broadcast %cst_41 : f32 to vector<8x1xf32>
    %120 = arith.divf %118, %119 : vector<8x1xf32>
    %121 = vector.broadcast %111 : vector<8x1xf32> to vector<8x32xf32>
    %122 = arith.subf %105, %121 : vector<8x32xf32>
    %cst_42 = arith.constant 9.99999996E-13 : f32
    %123 = vector.broadcast %cst_42 : f32 to vector<8x1xf32>
    %124 = arith.addf %120, %123 : vector<8x1xf32>
    %125 = math.rsqrt %124 : vector<8x1xf32>
    %126 = vector.broadcast %125 : vector<8x1xf32> to vector<8x32xf32>
    %127 = arith.mulf %122, %126 : vector<8x32xf32>
    %128 = vector.broadcast %106 : vector<1x32xf32> to vector<8x32xf32>
    %129 = arith.mulf %127, %128 : vector<8x32xf32>
    %130 = vector.broadcast %107 : vector<1x32xf32> to vector<8x32xf32>
    %131 = arith.addf %129, %130 : vector<8x32xf32>
    %c0_43 = arith.constant 0 : index
    %c0_44 = arith.constant 0 : index
    %132 = vector.load %arg13[%c0_43, %c0_44] : memref<32x64xf32, #tpu.memory_space<vmem>>, vector<32x64xf32>
    %cst_45 = arith.constant dense<0.000000e+00> : vector<8x64xf32>
    %133 = tpu.matmul %131, %132, %cst_45 {dimension_numbers = #tpu.dot_dimension_numbers<[1], [0], [0], [1], [0, 0, 1, 1], [], []>} : vector<8x32xf32>, vector<32x64xf32>, vector<8x64xf32> -> vector<8x64xf32>
    %c0_46 = arith.constant 0 : index
    %c0_47 = arith.constant 0 : index
    %134 = vector.load %arg14[%c0_46, %c0_47] : memref<1x64xf32, #tpu.memory_space<vmem>>, vector<1x64xf32>
    %135 = vector.broadcast %134 : vector<1x64xf32> to vector<8x64xf32>
    %136 = arith.addf %133, %135 : vector<8x64xf32>
    %137 = arith.mulf %136, %136 : vector<8x64xf32>
    %138 = arith.mulf %136, %137 : vector<8x64xf32>
    %cst_48 = arith.constant 4.471500e-02 : f32
    %139 = vector.broadcast %cst_48 : f32 to vector<8x64xf32>
    %140 = arith.mulf %139, %138 : vector<8x64xf32>
    %141 = arith.addf %136, %140 : vector<8x64xf32>
    %cst_49 = arith.constant 0.797884583 : f32
    %142 = vector.broadcast %cst_49 : f32 to vector<8x64xf32>
    %143 = arith.mulf %142, %141 : vector<8x64xf32>
    %144 = math.tanh %143 : vector<8x64xf32>
    %cst_50 = arith.constant 1.000000e+00 : f32
    %145 = vector.broadcast %cst_50 : f32 to vector<8x64xf32>
    %146 = arith.addf %145, %144 : vector<8x64xf32>
    %cst_51 = arith.constant 5.000000e-01 : f32
    %147 = vector.broadcast %cst_51 : f32 to vector<8x64xf32>
    %148 = arith.mulf %147, %146 : vector<8x64xf32>
    %149 = arith.mulf %136, %148 : vector<8x64xf32>
    %c0_52 = arith.constant 0 : index
    %c0_53 = arith.constant 0 : index
    %150 = vector.load %arg15[%c0_52, %c0_53] : memref<64x32xf32, #tpu.memory_space<vmem>>, vector<64x32xf32>
    %cst_54 = arith.constant dense<0.000000e+00> : vector<8x32xf32>
    %151 = tpu.matmul %149, %150, %cst_54 {dimension_numbers = #tpu.dot_dimension_numbers<[1], [0], [0], [1], [0, 0, 1, 1], [], []>} : vector<8x64xf32>, vector<64x32xf32>, vector<8x32xf32> -> vector<8x32xf32>
    %c0_55 = arith.constant 0 : index
    %c0_56 = arith.constant 0 : index
    %152 = vector.load %arg16[%c0_55, %c0_56] : memref<1x32xf32, #tpu.memory_space<vmem>>, vector<1x32xf32>
    %153 = vector.broadcast %152 : vector<1x32xf32> to vector<8x32xf32>
    %154 = arith.addf %151, %153 : vector<8x32xf32>
    %155 = arith.addf %154, %131 : vector<8x32xf32>
    %c0_57 = arith.constant 0 : index
    %c0_58 = arith.constant 0 : index
    %156 = vector.load %arg17[%c0_57, %c0_58] : memref<1x32xf32, #tpu.memory_space<vmem>>, vector<1x32xf32>
    %c0_59 = arith.constant 0 : index
    %c0_60 = arith.constant 0 : index
    %157 = vector.load %arg18[%c0_59, %c0_60] : memref<1x32xf32, #tpu.memory_space<vmem>>, vector<1x32xf32>
    %cst_61 = arith.constant dense<0.000000e+00> : vector<8xf32>
    %158 = vector.multi_reduction <add>, %155, %cst_61 [1] : vector<8x32xf32> to vector<8xf32>
    %159 = vector.shape_cast %158 : vector<8xf32> to vector<8x1xf32>
    %cst_62 = arith.constant 3.200000e+01 : f32
    %160 = vector.broadcast %cst_62 : f32 to vector<8x1xf32>
    %161 = arith.divf %159, %160 : vector<8x1xf32>
    %162 = vector.broadcast %161 : vector<8x1xf32> to vector<8x32xf32>
    %163 = arith.subf %155, %162 : vector<8x32xf32>
    %164 = vector.broadcast %161 : vector<8x1xf32> to vector<8x32xf32>
    %165 = arith.subf %155, %164 : vector<8x32xf32>
    %166 = arith.mulf %163, %165 : vector<8x32xf32>
    %cst_63 = arith.constant dense<0.000000e+00> : vector<8xf32>
    %167 = vector.multi_reduction <add>, %166, %cst_63 [1] : vector<8x32xf32> to vector<8xf32>
    %168 = vector.shape_cast %167 : vector<8xf32> to vector<8x1xf32>
    %cst_64 = arith.constant 3.200000e+01 : f32
    %169 = vector.broadcast %cst_64 : f32 to vector<8x1xf32>
    %170 = arith.divf %168, %169 : vector<8x1xf32>
    %171 = vector.broadcast %161 : vector<8x1xf32> to vector<8x32xf32>
    %172 = arith.subf %155, %171 : vector<8x32xf32>
    %cst_65 = arith.constant 9.99999996E-13 : f32
    %173 = vector.broadcast %cst_65 : f32 to vector<8x1xf32>
    %174 = arith.addf %170, %173 : vector<8x1xf32>
    %175 = math.rsqrt %174 : vector<8x1xf32>
    %176 = vector.broadcast %175 : vector<8x1xf32> to vector<8x32xf32>
    %177 = arith.mulf %172, %176 : vector<8x32xf32>
    %178 = vector.broadcast %156 : vector<1x32xf32> to vector<8x32xf32>
    %179 = arith.mulf %177, %178 : vector<8x32xf32>
    %180 = vector.broadcast %157 : vector<1x32xf32> to vector<8x32xf32>
    %181 = arith.addf %179, %180 : vector<8x32xf32>
    %c0_66 = arith.constant 0 : index
    %c0_67 = arith.constant 0 : index
    %182 = vector.load %arg19[%c0_66, %c0_67] : memref<32x96xf32, #tpu.memory_space<vmem>>, vector<32x96xf32>
    %cst_68 = arith.constant dense<0.000000e+00> : vector<8x96xf32>
    %183 = tpu.matmul %181, %182, %cst_68 {dimension_numbers = #tpu.dot_dimension_numbers<[1], [0], [0], [1], [0, 0, 1, 1], [], []>} : vector<8x32xf32>, vector<32x96xf32>, vector<8x96xf32> -> vector<8x96xf32>
    %c0_69 = arith.constant 0 : index
    %c0_70 = arith.constant 0 : index
    %184 = vector.load %arg20[%c0_69, %c0_70] : memref<1x96xf32, #tpu.memory_space<vmem>>, vector<1x96xf32>
    %185 = vector.broadcast %184 : vector<1x96xf32> to vector<8x96xf32>
    %186 = arith.addf %183, %185 : vector<8x96xf32>
    %187 = vector.extract_strided_slice %186 {offsets = [0, 0], sizes = [8, 8], strides = [1, 1]} : vector<8x96xf32> to vector<8x8xf32>
    %188 = vector.extract_strided_slice %186 {offsets = [0, 8], sizes = [8, 8], strides = [1, 1]} : vector<8x96xf32> to vector<8x8xf32>
    %189 = vector.extract_strided_slice %186 {offsets = [0, 16], sizes = [8, 8], strides = [1, 1]} : vector<8x96xf32> to vector<8x8xf32>
    %190 = vector.extract_strided_slice %186 {offsets = [0, 24], sizes = [8, 8], strides = [1, 1]} : vector<8x96xf32> to vector<8x8xf32>
    %191 = vector.shape_cast %187 : vector<8x8xf32> to vector<1x8x8xf32>
    %192 = vector.shape_cast %188 : vector<8x8xf32> to vector<1x8x8xf32>
    %193 = vector.shape_cast %189 : vector<8x8xf32> to vector<1x8x8xf32>
    %194 = vector.shape_cast %190 : vector<8x8xf32> to vector<1x8x8xf32>
    %195 = tpu.concatenate %191, %192, %193, %194 in 0 : vector<1x8x8xf32>, vector<1x8x8xf32>, vector<1x8x8xf32>, vector<1x8x8xf32> -> vector<4x8x8xf32>
    %196 = vector.extract_strided_slice %186 {offsets = [0, 32], sizes = [8, 8], strides = [1, 1]} : vector<8x96xf32> to vector<8x8xf32>
    %197 = vector.extract_strided_slice %186 {offsets = [0, 40], sizes = [8, 8], strides = [1, 1]} : vector<8x96xf32> to vector<8x8xf32>
    %198 = vector.extract_strided_slice %186 {offsets = [0, 48], sizes = [8, 8], strides = [1, 1]} : vector<8x96xf32> to vector<8x8xf32>
    %199 = vector.extract_strided_slice %186 {offsets = [0, 56], sizes = [8, 8], strides = [1, 1]} : vector<8x96xf32> to vector<8x8xf32>
    %200 = vector.shape_cast %196 : vector<8x8xf32> to vector<1x8x8xf32>
    %201 = vector.shape_cast %197 : vector<8x8xf32> to vector<1x8x8xf32>
    %202 = vector.shape_cast %198 : vector<8x8xf32> to vector<1x8x8xf32>
    %203 = vector.shape_cast %199 : vector<8x8xf32> to vector<1x8x8xf32>
    %204 = tpu.concatenate %200, %201, %202, %203 in 0 : vector<1x8x8xf32>, vector<1x8x8xf32>, vector<1x8x8xf32>, vector<1x8x8xf32> -> vector<4x8x8xf32>
    %205 = vector.extract_strided_slice %186 {offsets = [0, 64], sizes = [8, 8], strides = [1, 1]} : vector<8x96xf32> to vector<8x8xf32>
    %206 = vector.extract_strided_slice %186 {offsets = [0, 72], sizes = [8, 8], strides = [1, 1]} : vector<8x96xf32> to vector<8x8xf32>
    %207 = vector.extract_strided_slice %186 {offsets = [0, 80], sizes = [8, 8], strides = [1, 1]} : vector<8x96xf32> to vector<8x8xf32>
    %208 = vector.extract_strided_slice %186 {offsets = [0, 88], sizes = [8, 8], strides = [1, 1]} : vector<8x96xf32> to vector<8x8xf32>
    %209 = vector.shape_cast %205 : vector<8x8xf32> to vector<1x8x8xf32>
    %210 = vector.shape_cast %206 : vector<8x8xf32> to vector<1x8x8xf32>
    %211 = vector.shape_cast %207 : vector<8x8xf32> to vector<1x8x8xf32>
    %212 = vector.shape_cast %208 : vector<8x8xf32> to vector<1x8x8xf32>
    %213 = tpu.concatenate %209, %210, %211, %212 in 0 : vector<1x8x8xf32>, vector<1x8x8xf32>, vector<1x8x8xf32>, vector<1x8x8xf32> -> vector<4x8x8xf32>
    "tpu.trace_start"() <{level = 10 : i32, message = "hqd,hkd->hqk"}> : () -> ()
    %cst_71 = arith.constant dense<0.000000e+00> : vector<4x8x8xf32>
    %214 = tpu.matmul %195, %204, %cst_71 {dimension_numbers = #tpu.dot_dimension_numbers<[2], [2], [1], [1], [0, 0, 0, 1, 1, 1], [0], [0]>} : vector<4x8x8xf32>, vector<4x8x8xf32>, vector<4x8x8xf32> -> vector<4x8x8xf32>
    "tpu.trace_stop"() : () -> ()
    %215 = vector.broadcast %44 : vector<1x1x8xf32> to vector<4x8x8xf32>
    %216 = arith.addf %214, %215 : vector<4x8x8xf32>
    %cst_72 = arith.constant dense<0xFF800000> : vector<4x8xf32>
    %217 = vector.multi_reduction <maximumf>, %216, %cst_72 [2] : vector<4x8x8xf32> to vector<4x8xf32>
    %218 = vector.shape_cast %217 : vector<4x8xf32> to vector<4x8x1xf32>
    %219 = vector.broadcast %218 : vector<4x8x1xf32> to vector<4x8x8xf32>
    %220 = arith.subf %216, %219 : vector<4x8x8xf32>
    %221 = math.exp %220 : vector<4x8x8xf32>
    %cst_73 = arith.constant dense<0.000000e+00> : vector<4x8xf32>
    %222 = vector.multi_reduction <add>, %221, %cst_73 [2] : vector<4x8x8xf32> to vector<4x8xf32>
    %223 = vector.shape_cast %222 : vector<4x8xf32> to vector<4x8x1xf32>
    %224 = tpu.reciprocal %223 {approx = true} : vector<4x8x1xf32> -> vector<4x8x1xf32>
    %225 = vector.broadcast %224 : vector<4x8x1xf32> to vector<4x8x8xf32>
    %226 = arith.mulf %221, %225 : vector<4x8x8xf32>
    "tpu.trace_start"() <{level = 10 : i32, message = "hqk,hkd->hqd"}> : () -> ()
    %cst_74 = arith.constant dense<0.000000e+00> : vector<4x8x8xf32>
    %227 = tpu.matmul %226, %213, %cst_74 {dimension_numbers = #tpu.dot_dimension_numbers<[2], [1], [1], [2], [0, 0, 0, 1, 1, 2], [0], [0]>} : vector<4x8x8xf32>, vector<4x8x8xf32>, vector<4x8x8xf32> -> vector<4x8x8xf32>
    "tpu.trace_stop"() : () -> ()
    %228 = vector.extract_strided_slice %227 {offsets = [0, 0, 0], sizes = [1, 8, 8], strides = [1, 1, 1]} : vector<4x8x8xf32> to vector<1x8x8xf32>
    %229 = vector.shape_cast %228 : vector<1x8x8xf32> to vector<8x8xf32>
    %230 = vector.extract_strided_slice %227 {offsets = [1, 0, 0], sizes = [1, 8, 8], strides = [1, 1, 1]} : vector<4x8x8xf32> to vector<1x8x8xf32>
    %231 = vector.shape_cast %230 : vector<1x8x8xf32> to vector<8x8xf32>
    %232 = vector.extract_strided_slice %227 {offsets = [2, 0, 0], sizes = [1, 8, 8], strides = [1, 1, 1]} : vector<4x8x8xf32> to vector<1x8x8xf32>
    %233 = vector.shape_cast %232 : vector<1x8x8xf32> to vector<8x8xf32>
    %234 = vector.extract_strided_slice %227 {offsets = [3, 0, 0], sizes = [1, 8, 8], strides = [1, 1, 1]} : vector<4x8x8xf32> to vector<1x8x8xf32>
    %235 = vector.shape_cast %234 : vector<1x8x8xf32> to vector<8x8xf32>
    %236 = tpu.concatenate %229, %231, %233, %235 in 1 : vector<8x8xf32>, vector<8x8xf32>, vector<8x8xf32>, vector<8x8xf32> -> vector<8x32xf32>
    %c0_75 = arith.constant 0 : index
    %c0_76 = arith.constant 0 : index
    %237 = vector.load %arg21[%c0_75, %c0_76] : memref<32x32xf32, #tpu.memory_space<vmem>>, vector<32x32xf32>
    %cst_77 = arith.constant dense<0.000000e+00> : vector<8x32xf32>
    %238 = tpu.matmul %236, %237, %cst_77 {dimension_numbers = #tpu.dot_dimension_numbers<[1], [0], [0], [1], [0, 0, 1, 1], [], []>} : vector<8x32xf32>, vector<32x32xf32>, vector<8x32xf32> -> vector<8x32xf32>
    %c0_78 = arith.constant 0 : index
    %c0_79 = arith.constant 0 : index
    %239 = vector.load %arg22[%c0_78, %c0_79] : memref<1x32xf32, #tpu.memory_space<vmem>>, vector<1x32xf32>
    %240 = vector.broadcast %239 : vector<1x32xf32> to vector<8x32xf32>
    %241 = arith.addf %238, %240 : vector<8x32xf32>
    %242 = arith.addf %241, %181 : vector<8x32xf32>
    %c0_80 = arith.constant 0 : index
    %c0_81 = arith.constant 0 : index
    %243 = vector.load %arg23[%c0_80, %c0_81] : memref<1x32xf32, #tpu.memory_space<vmem>>, vector<1x32xf32>
    %c0_82 = arith.constant 0 : index
    %c0_83 = arith.constant 0 : index
    %244 = vector.load %arg24[%c0_82, %c0_83] : memref<1x32xf32, #tpu.memory_space<vmem>>, vector<1x32xf32>
    %cst_84 = arith.constant dense<0.000000e+00> : vector<8xf32>
    %245 = vector.multi_reduction <add>, %242, %cst_84 [1] : vector<8x32xf32> to vector<8xf32>
    %246 = vector.shape_cast %245 : vector<8xf32> to vector<8x1xf32>
    %cst_85 = arith.constant 3.200000e+01 : f32
    %247 = vector.broadcast %cst_85 : f32 to vector<8x1xf32>
    %248 = arith.divf %246, %247 : vector<8x1xf32>
    %249 = vector.broadcast %248 : vector<8x1xf32> to vector<8x32xf32>
    %250 = arith.subf %242, %249 : vector<8x32xf32>
    %251 = vector.broadcast %248 : vector<8x1xf32> to vector<8x32xf32>
    %252 = arith.subf %242, %251 : vector<8x32xf32>
    %253 = arith.mulf %250, %252 : vector<8x32xf32>
    %cst_86 = arith.constant dense<0.000000e+00> : vector<8xf32>
    %254 = vector.multi_reduction <add>, %253, %cst_86 [1] : vector<8x32xf32> to vector<8xf32>
    %255 = vector.shape_cast %254 : vector<8xf32> to vector<8x1xf32>
    %cst_87 = arith.constant 3.200000e+01 : f32
    %256 = vector.broadcast %cst_87 : f32 to vector<8x1xf32>
    %257 = arith.divf %255, %256 : vector<8x1xf32>
    %258 = vector.broadcast %248 : vector<8x1xf32> to vector<8x32xf32>
    %259 = arith.subf %242, %258 : vector<8x32xf32>
    %cst_88 = arith.constant 9.99999996E-13 : f32
    %260 = vector.broadcast %cst_88 : f32 to vector<8x1xf32>
    %261 = arith.addf %257, %260 : vector<8x1xf32>
    %262 = math.rsqrt %261 : vector<8x1xf32>
    %263 = vector.broadcast %262 : vector<8x1xf32> to vector<8x32xf32>
    %264 = arith.mulf %259, %263 : vector<8x32xf32>
    %265 = vector.broadcast %243 : vector<1x32xf32> to vector<8x32xf32>
    %266 = arith.mulf %264, %265 : vector<8x32xf32>
    %267 = vector.broadcast %244 : vector<1x32xf32> to vector<8x32xf32>
    %268 = arith.addf %266, %267 : vector<8x32xf32>
    %c0_89 = arith.constant 0 : index
    %c0_90 = arith.constant 0 : index
    %269 = vector.load %arg25[%c0_89, %c0_90] : memref<32x64xf32, #tpu.memory_space<vmem>>, vector<32x64xf32>
    %cst_91 = arith.constant dense<0.000000e+00> : vector<8x64xf32>
    %270 = tpu.matmul %268, %269, %cst_91 {dimension_numbers = #tpu.dot_dimension_numbers<[1], [0], [0], [1], [0, 0, 1, 1], [], []>} : vector<8x32xf32>, vector<32x64xf32>, vector<8x64xf32> -> vector<8x64xf32>
    %c0_92 = arith.constant 0 : index
    %c0_93 = arith.constant 0 : index
    %271 = vector.load %arg26[%c0_92, %c0_93] : memref<1x64xf32, #tpu.memory_space<vmem>>, vector<1x64xf32>
    %272 = vector.broadcast %271 : vector<1x64xf32> to vector<8x64xf32>
    %273 = arith.addf %270, %272 : vector<8x64xf32>
    %274 = arith.mulf %273, %273 : vector<8x64xf32>
    %275 = arith.mulf %273, %274 : vector<8x64xf32>
    %cst_94 = arith.constant 4.471500e-02 : f32
    %276 = vector.broadcast %cst_94 : f32 to vector<8x64xf32>
    %277 = arith.mulf %276, %275 : vector<8x64xf32>
    %278 = arith.addf %273, %277 : vector<8x64xf32>
    %cst_95 = arith.constant 0.797884583 : f32
    %279 = vector.broadcast %cst_95 : f32 to vector<8x64xf32>
    %280 = arith.mulf %279, %278 : vector<8x64xf32>
    %281 = math.tanh %280 : vector<8x64xf32>
    %cst_96 = arith.constant 1.000000e+00 : f32
    %282 = vector.broadcast %cst_96 : f32 to vector<8x64xf32>
    %283 = arith.addf %282, %281 : vector<8x64xf32>
    %cst_97 = arith.constant 5.000000e-01 : f32
    %284 = vector.broadcast %cst_97 : f32 to vector<8x64xf32>
    %285 = arith.mulf %284, %283 : vector<8x64xf32>
    %286 = arith.mulf %273, %285 : vector<8x64xf32>
    %c0_98 = arith.constant 0 : index
    %c0_99 = arith.constant 0 : index
    %287 = vector.load %arg27[%c0_98, %c0_99] : memref<64x32xf32, #tpu.memory_space<vmem>>, vector<64x32xf32>
    %cst_100 = arith.constant dense<0.000000e+00> : vector<8x32xf32>
    %288 = tpu.matmul %286, %287, %cst_100 {dimension_numbers = #tpu.dot_dimension_numbers<[1], [0], [0], [1], [0, 0, 1, 1], [], []>} : vector<8x64xf32>, vector<64x32xf32>, vector<8x32xf32> -> vector<8x32xf32>
    %c0_101 = arith.constant 0 : index
    %c0_102 = arith.constant 0 : index
    %289 = vector.load %arg28[%c0_101, %c0_102] : memref<1x32xf32, #tpu.memory_space<vmem>>, vector<1x32xf32>
    %290 = vector.broadcast %289 : vector<1x32xf32> to vector<8x32xf32>
    %291 = arith.addf %288, %290 : vector<8x32xf32>
    %292 = arith.addf %291, %268 : vector<8x32xf32>
    %c0_103 = arith.constant 0 : index
    %c0_104 = arith.constant 0 : index
    %293 = vector.load %arg29[%c0_103, %c0_104] : memref<1x32xf32, #tpu.memory_space<vmem>>, vector<1x32xf32>
    %c0_105 = arith.constant 0 : index
    %c0_106 = arith.constant 0 : index
    %294 = vector.load %arg30[%c0_105, %c0_106] : memref<1x32xf32, #tpu.memory_space<vmem>>, vector<1x32xf32>
    %cst_107 = arith.constant dense<0.000000e+00> : vector<8xf32>
    %295 = vector.multi_reduction <add>, %292, %cst_107 [1] : vector<8x32xf32> to vector<8xf32>
    %296 = vector.shape_cast %295 : vector<8xf32> to vector<8x1xf32>
    %cst_108 = arith.constant 3.200000e+01 : f32
    %297 = vector.broadcast %cst_108 : f32 to vector<8x1xf32>
    %298 = arith.divf %296, %297 : vector<8x1xf32>
    %299 = vector.broadcast %298 : vector<8x1xf32> to vector<8x32xf32>
    %300 = arith.subf %292, %299 : vector<8x32xf32>
    %301 = vector.broadcast %298 : vector<8x1xf32> to vector<8x32xf32>
    %302 = arith.subf %292, %301 : vector<8x32xf32>
    %303 = arith.mulf %300, %302 : vector<8x32xf32>
    %cst_109 = arith.constant dense<0.000000e+00> : vector<8xf32>
    %304 = vector.multi_reduction <add>, %303, %cst_109 [1] : vector<8x32xf32> to vector<8xf32>
    %305 = vector.shape_cast %304 : vector<8xf32> to vector<8x1xf32>
    %cst_110 = arith.constant 3.200000e+01 : f32
    %306 = vector.broadcast %cst_110 : f32 to vector<8x1xf32>
    %307 = arith.divf %305, %306 : vector<8x1xf32>
    %308 = vector.broadcast %298 : vector<8x1xf32> to vector<8x32xf32>
    %309 = arith.subf %292, %308 : vector<8x32xf32>
    %cst_111 = arith.constant 9.99999996E-13 : f32
    %310 = vector.broadcast %cst_111 : f32 to vector<8x1xf32>
    %311 = arith.addf %307, %310 : vector<8x1xf32>
    %312 = math.rsqrt %311 : vector<8x1xf32>
    %313 = vector.broadcast %312 : vector<8x1xf32> to vector<8x32xf32>
    %314 = arith.mulf %309, %313 : vector<8x32xf32>
    %315 = vector.broadcast %293 : vector<1x32xf32> to vector<8x32xf32>
    %316 = arith.mulf %314, %315 : vector<8x32xf32>
    %317 = vector.broadcast %294 : vector<1x32xf32> to vector<8x32xf32>
    %318 = arith.addf %316, %317 : vector<8x32xf32>
    %319 = vector.extract_strided_slice %318 {offsets = [0, 0], sizes = [1, 32], strides = [1, 1]} : vector<8x32xf32> to vector<1x32xf32>
    %c0_112 = arith.constant 0 : index
    %c0_113 = arith.constant 0 : index
    %320 = vector.load %arg31[%c0_112, %c0_113] : memref<32x3xf32, #tpu.memory_space<vmem>>, vector<32x3xf32>
    %cst_114 = arith.constant dense<0.000000e+00> : vector<1x3xf32>
    %321 = tpu.matmul %319, %320, %cst_114 {dimension_numbers = #tpu.dot_dimension_numbers<[1], [0], [0], [1], [0, 0, 1, 1], [], []>} : vector<1x32xf32>, vector<32x3xf32>, vector<1x3xf32> -> vector<1x3xf32>
    %c0_115 = arith.constant 0 : index
    %c0_116 = arith.constant 0 : index
    %322 = vector.load %arg32[%c0_115, %c0_116] : memref<1x3xf32, #tpu.memory_space<vmem>>, vector<1x3xf32>
    %323 = arith.addf %321, %322 : vector<1x3xf32>
    %c0_117 = arith.constant 0 : index
    %c0_118 = arith.constant 0 : index
    %c0_119 = arith.constant 0 : index
    %324 = vector.load %arg33[%c0_117, %c0_118, %c0_119] : memref<1x1x3xf32, #tpu.memory_space<vmem>>, vector<1x1x3xf32>
    %325 = vector.shape_cast %324 : vector<1x1x3xf32> to vector<1x3xf32>
    %326 = vector.shape_cast %323 : vector<1x3xf32> to vector<1x1x3xf32>
    tpu.vector_store %arg33[%c0_117, %c0_118, %c0_119], %326 {strides = array<i32>} : memref<1x1x3xf32, #tpu.memory_space<vmem>>, vector<1x1x3xf32>,
    return
  }
  func.func @transform_0(%arg0: i32) -> (i32, i32, i32) {
    %c0_i32 = arith.constant 0 : i32
    %c0_i32_0 = arith.constant 0 : i32
    %c0_i32_1 = arith.constant 0 : i32
    return %arg0, %c0_i32, %c0_i32_0 : i32, i32, i32
  }
  func.func @transform_1(%arg0: i32) -> (i32, i32, i32) {
    %c0_i32 = arith.constant 0 : i32
    %c0_i32_0 = arith.constant 0 : i32
    %c0_i32_1 = arith.constant 0 : i32
    return %arg0, %c0_i32, %c0_i32_0 : i32, i32, i32
  }
  func.func @transform_2(%arg0: i32) -> (i32, i32) {
    %c0_i32 = arith.constant 0 : i32
    %c0_i32_0 = arith.constant 0 : i32
    %c0_i32_1 = arith.constant 0 : i32
    return %c0_i32, %c0_i32_0 : i32, i32
  }
  func.func @transform_3(%arg0: i32) -> (i32, i32) {
    %c0_i32 = arith.constant 0 : i32
    %c0_i32_0 = arith.constant 0 : i32
    %c0_i32_1 = arith.constant 0 : i32
    return %c0_i32, %c0_i32_0 : i32, i32
  }
  func.func @transform_4(%arg0: i32) -> (i32, i32) {
    %c0_i32 = arith.constant 0 : i32
    %c0_i32_0 = arith.constant 0 : i32
    %c0_i32_1 = arith.constant 0 : i32
    return %c0_i32, %c0_i32_0 : i32, i32
  }
  func.func @transform_5(%arg0: i32) -> (i32, i32) {
    %c0_i32 = arith.constant 0 : i32
    %c0_i32_0 = arith.constant 0 : i32
    %c0_i32_1 = arith.constant 0 : i32
    return %c0_i32, %c0_i32_0 : i32, i32
  }
  func.func @transform_6(%arg0: i32) -> (i32, i32) {
    %c0_i32 = arith.constant 0 : i32
    %c0_i32_0 = arith.constant 0 : i32
    %c0_i32_1 = arith.constant 0 : i32
    return %c0_i32, %c0_i32_0 : i32, i32
  }
  func.func @transform_7(%arg0: i32) -> (i32, i32) {
    %c0_i32 = arith.constant 0 : i32
    %c0_i32_0 = arith.constant 0 : i32
    %c0_i32_1 = arith.constant 0 : i32
    return %c0_i32, %c0_i32_0 : i32, i32
  }
  func.func @transform_8(%arg0: i32) -> (i32, i32) {
    %c0_i32 = arith.constant 0 : i32
    %c0_i32_0 = arith.constant 0 : i32
    %c0_i32_1 = arith.constant 0 : i32
    return %c0_i32, %c0_i32_0 : i32, i32
  }
  func.func @transform_9(%arg0: i32) -> (i32, i32) {
    %c0_i32 = arith.constant 0 : i32
    %c0_i32_0 = arith.constant 0 : i32
    %c0_i32_1 = arith.constant 0 : i32
    return %c0_i32, %c0_i32_0 : i32, i32
  }
  func.func @transform_10(%arg0: i32) -> (i32, i32) {
    %c0_i32 = arith.constant 0 : i32
    %c0_i32_0 = arith.constant 0 : i32
    %c0_i32_1 = arith.constant 0 : i32
    return %c0_i32, %c0_i32_0 : i32, i32
  }
  func.func @transform_11(%arg0: i32) -> (i32, i32) {
    %c0_i32 = arith.constant 0 : i32
    %c0_i32_0 = arith.constant 0 : i32
    %c0_i32_1 = arith.constant 0 : i32
    return %c0_i32, %c0_i32_0 : i32, i32
  }
  func.func @transform_12(%arg0: i32) -> (i32, i32) {
    %c0_i32 = arith.constant 0 : i32
    %c0_i32_0 = arith.constant 0 : i32
    %c0_i32_1 = arith.constant 0 : i32
    return %c0_i32, %c0_i32_0 : i32, i32
  }
  func.func @transform_13(%arg0: i32) -> (i32, i32) {
    %c0_i32 = arith.constant 0 : i32
    %c0_i32_0 = arith.constant 0 : i32
    %c0_i32_1 = arith.constant 0 : i32
    return %c0_i32, %c0_i32_0 : i32, i32
  }
  func.func @transform_14(%arg0: i32) -> (i32, i32) {
    %c0_i32 = arith.constant 0 : i32
    %c0_i32_0 = arith.constant 0 : i32
    %c0_i32_1 = arith.constant 0 : i32
    return %c0_i32, %c0_i32_0 : i32, i32
  }
  func.func @transform_15(%arg0: i32) -> (i32, i32) {
    %c0_i32 = arith.constant 0 : i32
    %c0_i32_0 = arith.constant 0 : i32
    %c0_i32_1 = arith.constant 0 : i32
    return %c0_i32, %c0_i32_0 : i32, i32
  }
  func.func @transform_16(%arg0: i32) -> (i32, i32) {
    %c0_i32 = arith.constant 0 : i32
    %c0_i32_0 = arith.constant 0 : i32
    %c0_i32_1 = arith.constant 0 : i32
    return %c0_i32, %c0_i32_0 : i32, i32
  }
  func.func @transform_17(%arg0: i32) -> (i32, i32) {
    %c0_i32 = arith.constant 0 : i32
    %c0_i32_0 = arith.constant 0 : i32
    %c0_i32_1 = arith.constant 0 : i32
    return %c0_i32, %c0_i32_0 : i32, i32
  }
  func.func @transform_18(%arg0: i32) -> (i32, i32) {
    %c0_i32 = arith.constant 0 : i32
    %c0_i32_0 = arith.constant 0 : i32
    %c0_i32_1 = arith.constant 0 : i32
    return %c0_i32, %c0_i32_0 : i32, i32
  }
  func.func @transform_19(%arg0: i32) -> (i32, i32) {
    %c0_i32 = arith.constant 0 : i32
    %c0_i32_0 = arith.constant 0 : i32
    %c0_i32_1 = arith.constant 0 : i32
    return %c0_i32, %c0_i32_0 : i32, i32
  }
  func.func @transform_20(%arg0: i32) -> (i32, i32) {
    %c0_i32 = arith.constant 0 : i32
    %c0_i32_0 = arith.constant 0 : i32
    %c0_i32_1 = arith.constant 0 : i32
    return %c0_i32, %c0_i32_0 : i32, i32
  }
  func.func @transform_21(%arg0: i32) -> (i32, i32) {
    %c0_i32 = arith.constant 0 : i32
    %c0_i32_0 = arith.constant 0 : i32
    %c0_i32_1 = arith.constant 0 : i32
    return %c0_i32, %c0_i32_0 : i32, i32
  }
  func.func @transform_22(%arg0: i32) -> (i32, i32) {
    %c0_i32 = arith.constant 0 : i32
    %c0_i32_0 = arith.constant 0 : i32
    %c0_i32_1 = arith.constant 0 : i32
    return %c0_i32, %c0_i32_0 : i32, i32
  }
  func.func @transform_23(%arg0: i32) -> (i32, i32) {
    %c0_i32 = arith.constant 0 : i32
    %c0_i32_0 = arith.constant 0 : i32
    %c0_i32_1 = arith.constant 0 : i32
    return %c0_i32, %c0_i32_0 : i32, i32
  }
  func.func @transform_24(%arg0: i32) -> (i32, i32) {
    %c0_i32 = arith.constant 0 : i32
    %c0_i32_0 = arith.constant 0 : i32
    %c0_i32_1 = arith.constant 0 : i32
    return %c0_i32, %c0_i32_0 : i32, i32
  }
  func.func @transform_25(%arg0: i32) -> (i32, i32) {
    %c0_i32 = arith.constant 0 : i32
    %c0_i32_0 = arith.constant 0 : i32
    %c0_i32_1 = arith.constant 0 : i32
    return %c0_i32, %c0_i32_0 : i32, i32
  }
  func.func @transform_26(%arg0: i32) -> (i32, i32) {
    %c0_i32 = arith.constant 0 : i32
    %c0_i32_0 = arith.constant 0 : i32
    %c0_i32_1 = arith.constant 0 : i32
    return %c0_i32, %c0_i32_0 : i32, i32
  }
  func.func @transform_27(%arg0: i32) -> (i32, i32) {
    %c0_i32 = arith.constant 0 : i32
    %c0_i32_0 = arith.constant 0 : i32
    %c0_i32_1 = arith.constant 0 : i32
    return %c0_i32, %c0_i32_0 : i32, i32
  }
  func.func @transform_28(%arg0: i32) -> (i32, i32) {
    %c0_i32 = arith.constant 0 : i32
    %c0_i32_0 = arith.constant 0 : i32
    %c0_i32_1 = arith.constant 0 : i32
    return %c0_i32, %c0_i32_0 : i32, i32
  }
  func.func @transform_29(%arg0: i32) -> (i32, i32) {
    %c0_i32 = arith.constant 0 : i32
    %c0_i32_0 = arith.constant 0 : i32
    %c0_i32_1 = arith.constant 0 : i32
    return %c0_i32, %c0_i32_0 : i32, i32
  }
  func.func @transform_30(%arg0: i32) -> (i32, i32) {
    %c0_i32 = arith.constant 0 : i32
    %c0_i32_0 = arith.constant 0 : i32
    %c0_i32_1 = arith.constant 0 : i32
    return %c0_i32, %c0_i32_0 : i32, i32
  }
  func.func @transform_31(%arg0: i32) -> (i32, i32) {
    %c0_i32 = arith.constant 0 : i32
    %c0_i32_0 = arith.constant 0 : i32
    %c0_i32_1 = arith.constant 0 : i32
    return %c0_i32, %c0_i32_0 : i32, i32
  }
  func.func @transform_32(%arg0: i32) -> (i32, i32, i32) {
    %c0_i32 = arith.constant 0 : i32
    %c0_i32_0 = arith.constant 0 : i32
    %c0_i32_1 = arith.constant 0 : i32
    return %arg0, %c0_i32, %c0_i32_0 : i32, i32, i32
  }
}

</mosaic_0001>

<bundles_post_ra>
// kernel: distilbert_baseline_forward.1
= control target key start
LH: loop header
LB: loop body
LE: loop exit
PB: predicated region body
PF: predicated region fallthrough
CT: control target
= control target key end

     0   :  { %s4169_s6 = smov 1   ;;  %s4170_s10 = smov 2   ;;  %s4798_s0 = inlined_call_operand.smem [shape: u32[33], index: -1, kind: input, shape index: {}] }
   0x1   :  { %s4224_s5 = sld [smem:[%s4798_s0]]   ;;  %s4171_s14 = smov 3  }
   0x2   :  { %s4229_s9 = sld [smem:[%s4798_s0 + %s4169_s6]]   ;;  %s4172_s18 = smov 4  }
   0x3   :  { %s4234_s13 = sld [smem:[%s4798_s0 + %s4170_s10]]   ;;  %s4173_s22 = smov 5  }
   0x4   :  { %s4239_s17 = sld [smem:[%s4798_s0 + %s4171_s14]]   ;;  %s4174_s26 = smov 6  }
   0x5   :  { %s4244_s21 = sld [smem:[%s4798_s0 + %s4172_s18]]   ;;  %s4175_s30 = smov 7  }
   0x6   :  { %s4249_s25 = sld [smem:[%s4798_s0 + %s4173_s22]]   ;;  %s4176_s4 = smov 8  }
   0x7   :  { %4818 = sst [smem:[#allocation5_spill]] %s4224_s5  ;;  %s4177_s10 = smov 9  }
   0x8   :  { %4819 = sst [smem:[#allocation6_spill]] %s4229_s9  ;;  %s4178_s15 = smov 10  }
   0x9   :  { %s4254_s29 = sld [smem:[%s4798_s0 + %s4174_s26]]   ;;  %s4179_s20 = smov 11  }
   0xa   :  { %s4259_s3 = sld [smem:[%s4798_s0 + %s4175_s30]]   ;;  %s4180_s26 = smov 12  }
   0xb   :  { %s4264_s8 = sld [smem:[%s4798_s0 + %s4176_s4]]   ;;  %s4181_s1 = smov 13  }
   0xc   :  { %s4269_s14 = sld [smem:[%s4798_s0 + %s4177_s10]]   ;;  %s4182_s7 = smov 14  }
   0xd   :  { %s4274_s19 = sld [smem:[%s4798_s0 + %s4178_s15]]   ;;  %s4183_s15 = smov 15  }
   0xe   :  { %s4279_s24 = sld [smem:[%s4798_s0 + %s4179_s20]]   ;;  %s4184_s22 = smov 16  }
   0xf   :  { %s4284_s30 = sld [smem:[%s4798_s0 + %s4180_s26]]   ;;  %s4185_s28 = smov 17  }
  0x10   :  { %4820 = sst [smem:[#allocation7_spill]] %s4259_s3 }
  0x11   :  { %4821 = sst [smem:[#allocation8_spill]] %s4264_s8 }
  0x12   :  { %s4289_s6 = sld [smem:[%s4798_s0 + %s4181_s1]]  }
  0x13   :  { %s4294_s12 = sld [smem:[%s4798_s0 + %s4182_s7]]   ;;  %s4186_s7 = smov 18  }
  0x14   :  { %s4299_s20 = sld [smem:[%s4798_s0 + %s4183_s15]]   ;;  %s4187_s15 = smov 19  }
  0x15   :  { %s4304_s27 = sld [smem:[%s4798_s0 + %s4184_s22]]   ;;  %s4188_s22 = smov 20  }
  0x16   :  { %s4309_s4 = sld [smem:[%s4798_s0 + %s4185_s28]]   ;;  %s4189_s28 = smov 21  }
  0x18   :  { %4822 = sst [smem:[#allocation9_spill]] %s4289_s6 }
  0x19   :  { %4823 = sst [smem:[#allocation10_spill]] %s4294_s12 }
  0x1a   :  { %4824 = sst [smem:[#allocation11_spill]] %s4299_s20 }
  0x1b   :  { %4825 = sst [smem:[#allocation12_spill]] %s4304_s27 }
  0x1c   :  { %4826 = sst [smem:[#allocation13_spill]] %s4309_s4 }
  0x1d   :  { %s4314_s6 = sld [smem:[%s4798_s0 + %s4186_s7]]   ;;  %s4190_s7 = smov 22  }
  0x1e   :  { %s4319_s20 = sld [smem:[%s4798_s0 + %s4187_s15]]   ;;  %s4191_s15 = smov 23  }
  0x1f   :  { %s4324_s27 = sld [smem:[%s4798_s0 + %s4188_s22]]   ;;  %s4192_s22 = smov 24  }
  0x20   :  { %s4329_s4 = sld [smem:[%s4798_s0 + %s4189_s28]]   ;;  %s4193_s28 = smov 25  }
  0x23   :  { %4827 = sst [smem:[#allocation14_spill]] %s4314_s6 }
  0x24   :  { %4828 = sst [smem:[#allocation15_spill]] %s4319_s20 }
  0x25   :  { %4829 = sst [smem:[#allocation16_spill]] %s4324_s27 }
  0x26   :  { %4830 = sst [smem:[#allocation17_spill]] %s4329_s4 }
  0x27   :  { %s4334_s6 = sld [smem:[%s4798_s0 + %s4190_s7]]   ;;  %s4194_s7 = smov 26  }
  0x28   :  { %s4339_s20 = sld [smem:[%s4798_s0 + %s4191_s15]]   ;;  %s4195_s15 = smov 27  }
  0x29   :  { %s4344_s27 = sld [smem:[%s4798_s0 + %s4192_s22]]   ;;  %s4196_s22 = smov 28  }
  0x2a   :  { %s4349_s4 = sld [smem:[%s4798_s0 + %s4193_s28]]   ;;  %s4197_s28 = smov 29  }
  0x2d   :  { %4831 = sst [smem:[#allocation18_spill]] %s4334_s6 }
  0x2e   :  { %4832 = sst [smem:[#allocation19_spill]] %s4339_s20 }
  0x2f   :  { %4833 = sst [smem:[#allocation20_spill]] %s4344_s27 }
  0x30   :  { %4834 = sst [smem:[#allocation21_spill]] %s4349_s4 }
  0x31   :  { %s4354_s6 = sld [smem:[%s4798_s0 + %s4194_s7]]   ;;  %s4198_s7 = smov 30  }
  0x32   :  { %s4359_s20 = sld [smem:[%s4798_s0 + %s4195_s15]]   ;;  %s4199_s15 = smov 31  }
  0x33   :  { %s4364_s27 = sld [smem:[%s4798_s0 + %s4196_s22]]   ;;  %s4200_s22 = smov 32  }
  0x34   :  { %s4369_s4 = sld [smem:[%s4798_s0 + %s4197_s28]]  }
  0x37   :  { %4835 = sst [smem:[#allocation22_spill]] %s4354_s6 }
  0x38   :  { %4836 = sst [smem:[#allocation23_spill]] %s4359_s20 }
  0x39   :  { %4837 = sst [smem:[#allocation24_spill]] %s4364_s27 }
  0x3a   :  { %4838 = sst [smem:[#allocation25_spill]] %s4369_s4 }
  0x3b   :  { %s4374_s6 = sld [smem:[%s4798_s0 + %s4198_s7]]  }
  0x3c   :  { %s4379_s20 = sld [smem:[%s4798_s0 + %s4199_s15]]  }
  0x3d   :  { %s4384_s27 = sld [smem:[%s4798_s0 + %s4200_s22]]  }
  0x41   :  { %4839 = sst [smem:[#allocation26_spill]] %s4374_s6 }
  0x42   :  { %70 = vsyncpa [#allocation3], 0 }
  0x43   :  { %72 = vsyncpa [#allocation3 + $0x1], 0  ;;  %s4386_s28 = smov 0   ;;  %s4388_s1 = smov 0  }
  0x44   :  { %s4390_s2 = smov 0   ;;  %s4392_s7 = smov 0  }
  0x45 LB: > { %s4840_s12 = sld [smem:[#allocation10_spill]]  ;;  %s4841_s8 = sld [smem:[#allocation8_spill]]  ;;  %s4163_s2 = sphi %s4390_s2, %s4874_s2   ;;  %s4159_s1 = sphi %s4388_s1, %s4873_s1   ;;  %s4155_s28 = sphi %s4386_s28, %s4872_s28   ;;  %s4167_s7 = sphi %s4392_s7, %s4875_s7  }
  0x46   : > { %s4842_s6 = sld [smem:[#allocation26_spill]]  ;;  %s4407_s0 = sadd.s32 4294967295, %s4167_s7  }
  0x47   : > { %s3490_s10 = sadd.s32 4294967294, %s4167_s7   ;;  %s4411_s11 = sadd.s32 1, %s4167_s7  }
  0x48   : > { %s767_s15 = sadd.s32 1, %s4163_s2  ;;  %s764_s16 = ssub.s32 %s4167_s7, %s4411_s11 }
  0x49   : > { %p777_p0 = scmp.ne.s32.totalorder %s4163_s2, %s4159_s1  ;;  %p765_p1 = scmp.eq.s32.totalorder %s764_s16, 0 }
  0x4a   : > { %p778_p2 = scmp.eq.s32.totalorder %s4407_s0, 1  ;;  %p783_p3 = scmp.ne.s32.totalorder %s4159_s1, %s4155_s28 }
  0x4b   : > { %p784_p4 = scmp.eq.s32.totalorder %s3490_s10, 1  ;;  %p3493_p7 = scmp.ge.s32.totalorder %s4167_s7, 1 }
  0x4c   : > { %s4422_s18 = scalar_select %p765_p1, %s4163_s2, %s767_s15  }
  0x4d   : > { %p4424_p5 = por %p778_p2, %p777_p0  ;;  %p4428_p6 = por %p784_p4, %p783_p3 }
  0x4e   : > { %p905_p8 = scmp.lt.s32.totalorder %s4167_s7, 3 }
  0x50   : > { %p906_p9 = pnand %p3493_p7, %p905_p8 }
  0x51   : > { %s4845_s9 = sld [smem:[#allocation6_spill]] (!%p906_p9)  ;;  %p988_p10 = scmp.lt.s32.totalorder (!%p906_p9), %s4407_s0, 1  ;;  %v1004_v0 = vld [vmem:[%s4234_s13] sm:$0xff] (!%p906_p9)  ;;  %v996_v1 = vlaneseq (!%p906_p9)  ;;  %v4201_v2 = vmov (!%p906_p9), 0   ;;  %v4202_v3 = vmov (!%p906_p9), 0.0|0.0   ;;  %v1005_v4 = vld [vmem:[%s4234_s13 + $0x8] sm:$0xff] (!%p906_p9) }
  0x52   : > { %909 = sbr.rel (%p906_p9) target bundleno = 6194 (0x1832), region = 148  ;;  %s4846_s5 = sld [smem:[#allocation5_spill]] (!%p906_p9)  ;;  %4058 = vset.pattern.permute.xlu0 (!%p906_p9), %v4201_v2  ;;  %3883 = vmatprep.subr.bf16.mxu0 (!%p906_p9), %v4202_v3  ;;  %v1006_v5 = vld [vmem:[%s4234_s13 + $0x10] sm:$0xff] (!%p906_p9)  ;;  %v1007_v6 = vld [vmem:[%s4234_s13 + $0x18] sm:$0xff] (!%p906_p9)  ;;  %v3884_v7 = vpack.c.bf16 (!%p906_p9), %v1005_v4, %v1004_v0  ;;  %v1008_v12 = vld [vmem:[%s4234_s13 + $0x20] sm:$0xff] (!%p906_p9)  ;;  %vm4204_vm1 = vmmov (!%p906_p9), 0  }
  0x53   : > { %v1218_v8 = vshrl.u32 (!%p906_p9), %v996_v1, 7  ;;  %3907 = vmatprep.subr.bf16.mxu1 (!%p906_p9), %v4202_v3  ;;  %v3887_v9 = vpack.c.bf16 (!%p906_p9), %v1007_v6, %v1006_v5  ;;  %v1009_v13 = vld [vmem:[%s4234_s13 + $0x28] sm:$0xff] (!%p906_p9)  ;;  %v4203_v15 = vmov (!%p906_p9), -1e+09   ;;  %v4205_v17 = vmov (!%p906_p9), 0.0   ;;  %v1010_v20 = vld [vmem:[%s4234_s13 + $0x30] sm:$0xff] (!%p906_p9) }
  0x54   : > { %3885 = vmatpush3.bf16.msra.mxu0 (!%p906_p9), %v3884_v7  ;;  %3685 = vmatprep.mubr.msk.f32.mxu0 (!%p906_p9), %vm4204_vm1, %v4205_v17  ;;  %v3890_v18 = vpack.c.bf16 (!%p906_p9), %v1009_v13, %v1008_v12  ;;  %v1011_v21 = vld [vmem:[%s4234_s13 + $0x38] sm:$0xff] (!%p906_p9)  ;;  %v1012_v23 = vld [vmem:[%s4234_s13 + $0x40] sm:$0xff] (!%p906_p9)  ;;  %v1013_v24 = vld [vmem:[%s4234_s13 + $0x48] sm:$0xff] (!%p906_p9)  ;;  %v997_v35 = vand.u32 (!%p906_p9), 127, %v996_v1  ;;  %v4206_v37 = vmov (!%p906_p9), 1.0   ;;  %vm1093_vm3 = vcmask (!%p906_p9), 261120  }
  0x55   : > { %v1219_v10 = vsub.s32 (!%p906_p9), 0, %v1218_v8  ;;  %3886 = vmatprep.subr.bf16.mxu0 (!%p906_p9), %v4202_v3  ;;  %3696 = vmatprep.mubr.msk.f32.mxu1 (!%p906_p9), %vm4204_vm1, %v4205_v17  ;;  %v3893_v22 = vpack.c.bf16 (!%p906_p9), %v1011_v21, %v1010_v20  ;;  %v3896_v25 = vpack.c.bf16 (!%p906_p9), %v1013_v24, %v1012_v23  ;;  %v1014_v26 = vld [vmem:[%s4234_s13 + $0x50] sm:$0xff] (!%p906_p9)  ;;  %v1015_v27 = vld [vmem:[%s4234_s13 + $0x58] sm:$0xff] (!%p906_p9)  ;;  %v1016_v29 = vld [vmem:[%s4234_s13 + $0x60] sm:$0xff] (!%p906_p9)  ;;  %s4847_s3 = sld [smem:[#allocation7_spill]] (!%p906_p9)  ;;  %vm1224_vm4 = vcmask (!%p906_p9), 64512  }
  0x56   : > { %v3899_v28 = vpack.c.bf16 (!%p906_p9), %v1015_v27, %v1014_v26  ;;  %v1017_v30 = vld [vmem:[%s4234_s13 + $0x68] sm:$0xff] (!%p906_p9)  ;;  %v1018_v32 = vld [vmem:[%s4234_s13 + $0x70] sm:$0xff] (!%p906_p9)  ;;  %v1019_v33 = vld [vmem:[%s4234_s13 + $0x78] sm:$0xff] (!%p906_p9)  ;;  %vm1888_vm5 = vcmask (!%p906_p9), 130048   ;;  %vm1890_vm6 = vcmask (!%p906_p9), 195584   ;;  %vm2114_vm7 = vcmask (!%p906_p9), 523264  }
  0x57   : > { %v3902_v31 = vpack.c.bf16 (!%p906_p9), %v1017_v30, %v1016_v29  ;;  %v3905_v34 = vpack.c.bf16 (!%p906_p9), %v1019_v33, %v1018_v32  ;;  %v1020_v38 = vld [vmem:[%s4239_s17] sm:$0xff] (!%p906_p9)  ;;  %v1126_v49 = vld [vmem:[%s4254_s29 + $0x8] sm:$0xff] (!%p906_p9)  ;;  %v1127_v50 = vld [vmem:[%s4254_s29 + $0x10] sm:$0xff] (!%p906_p9)  ;;  %s4871_s4 = sld [smem:[#allocation25_spill]] (!%p906_p9)  ;;  %vm3379_vm8 = vcmask (!%p906_p9), 16384  }
  0x58   : > { %3888 = vmatpush3.bf16.msra.mxu0 (!%p906_p9), %v3887_v9  ;;  %v1125_v48 = vld [vmem:[%s4254_s29] sm:$0xff] (!%p906_p9)  ;;  %v1128_v52 = vld [vmem:[%s4254_s29 + $0x18] sm:$0xff] (!%p906_p9) }
  0x59   : > { %s989_s26 = scalar_select %p988_p10, %s4407_s0, 1  ;;  %3889 = vmatprep.subr.bf16.mxu0 %v4202_v3  ;;  %v3908_v51 = vpack.c.bf16 %v1126_v49, %v1125_v48  ;;  %v3911_v53 = vpack.c.bf16 %v1128_v52, %v1127_v50  ;;  %v3497_v58 = vld [vmem:[%s4244_s21] ss:$0 sm:$0xff] }
  0x5a   : > { %v3498_v60 = vld [vmem:[%s4249_s25] ss:$0 sm:$0xff] }
  0x5b   : > { %s3494_s10 = sshll.u32 %s989_s26, 3  ;;  %s994_s15 = scalar_lea.vmem %s4845_s9, %s989_s26  ;;  %3909 = vmatpush3.bf16.msra.mxu1 %v3908_v51  ;;  %v3499_v63 = vld [vmem:[%s4847_s3] ss:$0 sm:$0xff] }
  0x5c   : > { %s991_s16 = scalar_lea.vmem %s4846_s5, %s3494_s10  ;;  %v1122_v11 = vld [vmem:[%s994_s15] sm:$0x1]  ;;  %3891 = vmatpush3.bf16.msra.mxu0 %v3890_v18  ;;  %3910 = vmatprep.subr.bf16.mxu1 %v4202_v3  ;;  %s4808_s26 = smov 120  }
  0x5d   : > { %v995_v14 = vld [vmem:[%s991_s16] sm:$0xff]  ;;  %vm1123_vm0 = vcmp.gt.s32.totalorder %v1122_v11, 0  ;;  %3892 = vmatprep.subr.bf16.mxu0 %v4202_v3  ;;  %s4812_s10 = smov 112   ;;  %s4807_s15 = smov 104  }
  0x5e   : > { %v1124_v16 = vsel %vm1123_vm0, 0.0, %v4203_v15  ;;  %999 = vperm.xlu0 %4058, %v995_v14   ;;  %s4803_s16 = smov 96   ;;  %s4854_s3 = smov 112  }
  0x5f   : > { %v4449_v19 = vrot.slane %v1124_v16, %v1219_v10  ;;  %3912 = vmatpush3.bf16.msra.mxu1 %v3911_v53  ;;  %s4855_s5 = smov 120  }
  0x60   : > { %3894 = vmatpush3.bf16.msra.mxu0 %v3893_v22  ;;  %3699 = vmatprep.subr.mxu1 %v4205_v17 }
  0x61   : > { %3895 = vmatprep.subr.bf16.mxu0 %v4202_v3 }
  0x64   : > { %3897 = vmatpush3.bf16.msra.mxu0 %v3896_v25 }
  0x65   : > { %3898 = vmatprep.subr.bf16.mxu0 %v4202_v3 }
  0x68   : > { %3900 = vmatpush3.bf16.msra.mxu0 %v3899_v28 }
  0x69   : > { %3901 = vmatprep.subr.bf16.mxu0 %v4202_v3 }
  0x6c   : > { %3903 = vmatpush3.bf16.msra.mxu0 %v3902_v31 }
  0x6d   : > { %3904 = vmatprep.subr.bf16.mxu0 %v4202_v3 }
  0x70   : > { %3906 = vmatpush3.bf16.msra.mxu0 %v3905_v34 }
  0x71   : > { %3913 = vmatprep.subr.bf16.mxu0 %v4202_v3 }
  0xdd   : > { %v1000_v36 = vpop.permute.xlu0 %999 }
  0xde   : > { %vm1001_vm2 = vcmp.eq.s32.totalorder %v1000_v36, %v997_v35 }
  0xdf   : > { %3686 = vmatmul.mubr.msk.f32.vlgmr.msra.gmra.mrb[0].mxu0 %vm1001_vm2, %v4206_v37 }
  0xe0   : > { %3747 = vmatprep.mubr.msk.f32.mxu0 %vm4204_vm1, %v4205_v17 }
 0x1b2   : > { %v1087_v39 = vpop.f32.mrb[0].mxu0 }
 0x1b3   : > { %v1088_v40 = vadd.f32 %v1087_v39, %v1020_v38  ;;  %v3687_v41 = vpop.f32.mrb[1].mxu0 }
 0x1b5   : > { %v1094_v42 = vsel %vm1093_vm3, %v1088_v40, 0.0 }
 0x1b6   : > { %1095 = vadd.xlane.f32.xlu0 %v1094_v42 }
 0x243   : > { %v1096_v43 = vpop.xlane.xlu0 %1095 }
 0x244   : > { %v1098_v44 = vmul.f32 0.03125, %v1096_v43 }
 0x246   : > { %v1099_v45 = vsub.f32 %v1088_v40, %v1098_v44 }
 0x248   : > { %v1100_v46 = vmul.f32 %v1099_v45, %v1099_v45 }
 0x24a   : > { %v1101_v47 = vsel %vm1093_vm3, %v1100_v46, 0.0 }
 0x24b   : > { %1102 = vadd.xlane.f32.xlu1 %v1101_v47 }
 0x2d8   : > { %v1103_v54 = vpop.xlane.xlu1 %1102 }
 0x2d9   : > { %v1104_v55 = vmul.f32 0.03125, %v1103_v54 }
 0x2db   : > { %v1105_v56 = vadd.f32 1e-12, %v1104_v55 }
 0x2dd   : > { %4059 = vrsqrt.f32 %v1105_v56 }
 0x2e7   : > { %v4060_v57 = vpop.eup %4059 }
 0x2e8   : > { %v1107_v59 = vmul.f32 %v4060_v57, %v1099_v45 }
 0x2ea   : > { %v1114_v61 = vmul.f32 %v3497_v58, %v1107_v59 }
 0x2ec   : > { %v4483_v62 = vadd.f32 %v3498_v60, %v1114_v61 }
 0x2ee   : > { %3697 = vmatmul.mubr.msk.f32.vlgmr.msra.gmra.mrb[0].mxu1 %vm1093_vm3, %v4483_v62 }
 0x2ef   : > { %3701 = vmatprep.mubr.msk.f32.mxu1 %vm4204_vm1, %v4205_v17 }
 0x3c1   : > { %v1205_v0 = vpop.f32.mrb[0].mxu1 }
 0x3c2   : > { %v1206_v1 = vadd.f32 %v3499_v63, %v1205_v0  ;;  %v3698_v2 = vpop.f32.mrb[1].mxu1 }
 0x3c4   : > { %1210 = vrot.lane.b32.xlu1 %v1206_v1, %s4808_s26  ;;  %s4809_s26 = smov 24  }
 0x3c8   : > { %1212 = vrot.lane.b32.xlu1 %v1206_v1, %s4812_s10  ;;  %s4853_s10 = sld [smem:[#allocation15_spill]] }
 0x3cc   : > { %1214 = vrot.lane.b32.xlu1 %v1206_v1, %s4807_s15  ;;  %s4810_s15 = smov 16  }
 0x3d0   : > { %1222 = vrot.lane.b32.xlu1 %v1206_v1, %s4803_s16 }
 0x436   : > { %v4494_v4 = vpop.permute.xlu1 %1210 }
 0x437   : > { %1299 = vrot.lane.b32.xlu1 %v4494_v4, %s4803_s16 }
 0x43a   : > { %v4498_v5 = vpop.permute.xlu1 %1212 }
 0x43b   : > { %1375 = vrot.lane.b32.xlu0 %v4498_v5, %s4803_s16 }
 0x43e   : > { %v4502_v6 = vpop.permute.xlu1 %1214 }
 0x43f   : > { %1451 = vrot.lane.b32.xlu1 %v4502_v6, %s4803_s16  ;;  %s4805_s16 = smov 64  }
 0x442   : > { %v1223_v7 = vpop.permute.xlu1 %1222 }
 0x443   : > { %3700 = vmatpush3.xpose.msk.msra.mxu1 %vm1224_vm4, %v1223_v7 }
 0x444   : > { %3704 = vmatprep.subr.mxu1 %v4205_v17 }
 0x446   : > { %3702 = vmatmul.mubr.msk.f32.vlgmr.msra.gmra.mrb[2].mxu1 %vm1224_vm4, %v1206_v1 }
 0x447   : > { %3706 = vmatprep.mubr.msk.f32.mxu1 %vm4204_vm1, %v4205_v17 }
 0x4a9   : > { %v1300_v8 = vpop.permute.xlu1 %1299 }
 0x4aa   : > { %3705 = vmatpush3.xpose.msk.msra.mxu1 %vm1224_vm4, %v1300_v8  ;;  %v1894_v8 = vld [vmem:[%s4841_s8 + $0x10] sm:$0xff] }
 0x4ab   : > { %3709 = vmatprep.subr.mxu1 %v4205_v17 }
 0x4ad   : > { %v1376_v9 = vpop.permute.xlu0 %1375  ;;  %3707 = vmatmul.mubr.msk.f32.vlgmr.msra.gmra.mrb[4].mxu1 %vm1224_vm4, %v4494_v4 }
 0x4ae   : > { %3710 = vmatpush3.xpose.msk.msra.mxu1 %vm1224_vm4, %v1376_v9  ;;  %3711 = vmatprep.mubr.msk.f32.mxu1 %vm4204_vm1, %v4205_v17  ;;  %v1895_v9 = vld [vmem:[%s4841_s8 + $0x18] sm:$0xff] }
 0x4af   : > { %3714 = vmatprep.subr.mxu1 %v4205_v17 }
 0x4b1   : > { %3712 = vmatmul.mubr.msk.f32.vlgmr.msra.gmra.mrb[6].mxu1 %vm1224_vm4, %v4498_v5  ;;  %v1452_v10 = vpop.permute.xlu1 %1451 }
 0x4b2   : > { %3715 = vmatpush3.xpose.msk.msra.mxu1 %vm1224_vm4, %v1452_v10  ;;  %3716 = vmatprep.mubr.msk.f32.mxu1 %vm4204_vm1, %v4205_v17  ;;  %v3917_v10 = vpack.c.bf16 %v1895_v9, %v1894_v8 }
 0x4b3   : > { %3719 = vmatprep.subr.mxu1 %v4205_v17 }
 0x4b5   : > { %3717 = vmatmul.mubr.msk.f32.vlgmr.msra.gmra.mrb[8].mxu1 %vm1224_vm4, %v4502_v6 }
 0x4b6   : > { %3721 = vmatprep.mubr.msk.f32.mxu1 %vm4204_vm1, %v4205_v17 }
 0x519   : > { %v1295_v11 = vpop.f32.mrb[2].mxu1 }
 0x51a   : > { %v1296_v12 = vadd.f32 %v1295_v11, %v4449_v19  ;;  %v3703_v13 = vpop.f32.mrb[3].mxu1 }
 0x51c   : > { %v1527_v14 = vsel %vm1224_vm4, %v1296_v12, -inf }
 0x51d   : > { %1528 = vmax.xlane.f32.xlu1 %v1527_v14 }
 0x580   : > { %v1371_v15 = vpop.f32.mrb[4].mxu1 }
 0x581   : > { %v1372_v16 = vadd.f32 %v1371_v15, %v4449_v19  ;;  %v3708_v18 = vpop.f32.mrb[5].mxu1 }
 0x583   : > { %v1530_v20 = vsel %vm1224_vm4, %v1372_v16, -inf }
 0x584   : > { %1531 = vmax.xlane.f32.xlu0 %v1530_v20  ;;  %v1447_v21 = vpop.f32.mrb[6].mxu1 }
 0x585   : > { %v1448_v22 = vadd.f32 %v1447_v21, %v4449_v19  ;;  %v3713_v23 = vpop.f32.mrb[7].mxu1 }
 0x587   : > { %v1533_v24 = vsel %vm1224_vm4, %v1448_v22, -inf }
 0x588   : > { %1534 = vmax.xlane.f32.xlu1 %v1533_v24  ;;  %v1523_v25 = vpop.f32.mrb[8].mxu1 }
 0x589   : > { %v1524_v26 = vadd.f32 %v1523_v25, %v4449_v19  ;;  %v3718_v27 = vpop.f32.mrb[9].mxu1  ;;  %v3513_v25 = vld [vmem:[%s4269_s14] ss:$0 sm:$0xff] }
 0x58b   : > { %v1536_v28 = vsel %vm1224_vm4, %v1524_v26, -inf }
 0x58c   : > { %1537 = vmax.xlane.f32.xlu1 %v1536_v28 }
 0x59d   : > { %1571 = vrot.lane.b32.xlu1 %v1206_v1, %s4805_s16 }
 0x5aa   : > { %v1529_v29 = vpop.xlane.xlu1 %1528 }
 0x5ab   : > { %v1539_v30 = vsub.f32 %v1296_v12, %v1529_v29 }
 0x5ad   : > { %v1543_v31 = vmul.f32 1.442695, %v1539_v30 }
 0x5af   : > { %4061 = vpow2.f32 %v1543_v31 }
 0x5b9   : > { %v4062_v32 = vpop.eup %4061 }
 0x5ba   : > { %v1551_v33 = vsel %vm1224_vm4, %v4062_v32, 0.0 }
 0x5c1   : > { %1552 = vadd.xlane.f32.xlu1 %v1551_v33 }
 0x611   : > { %v1532_v34 = vpop.xlane.xlu0 %1531 }
 0x612   : > { %v1540_v35 = vsub.f32 %v1372_v16, %v1532_v34 }
 0x614   : > { %v1545_v36 = vmul.f32 1.442695, %v1540_v35 }
 0x615   : > { %v1535_v37 = vpop.xlane.xlu1 %1534 }
 0x616   : > { %4063 = vpow2.f32 %v1545_v36  ;;  %v1541_v38 = vsub.f32 %v1448_v22, %v1535_v37  ;;  %v2006_v36 = vld [vmem:[%s4284_s30] sm:$0xff]  ;;  %v2007_v37 = vld [vmem:[%s4284_s30 + $0x8] sm:$0xff] }
 0x618   : > { %v1547_v39 = vmul.f32 1.442695, %v1541_v38  ;;  %v3920_v38 = vpack.c.bf16 %v2007_v37, %v2006_v36 }
 0x619   : > { %v1538_v40 = vpop.xlane.xlu1 %1537 }
 0x61a   : > { %4065 = vpow2.f32 %v1547_v39  ;;  %v1542_v41 = vsub.f32 %v1524_v26, %v1538_v40  ;;  %v2008_v39 = vld [vmem:[%s4284_s30 + $0x10] sm:$0xff]  ;;  %v2009_v40 = vld [vmem:[%s4284_s30 + $0x18] sm:$0xff] }
 0x61c   : > { %v1549_v42 = vmul.f32 1.442695, %v1542_v41 }
 0x61d   : > { %v1572_v43 = vpop.permute.xlu1 %1571 }
 0x61e   : > { %4067 = vpow2.f32 %v1549_v42  ;;  %3720 = vmatpush3.msra.mxu1 %v1572_v43 }
 0x61f   : > { %3724 = vmatprep.subr.mxu1 %v4205_v17 }
 0x620   : > { %v4064_v44 = vpop.eup %4063 }
 0x621   : > { %v1554_v45 = vsel %vm1224_vm4, %v4064_v44, 0.0 }
 0x622   : > { %1555 = vadd.xlane.f32.xlu0 %v1554_v45  ;;  %v3515_v45 = vld [vmem:[%s4274_s19] ss:$0 sm:$0xff] }
 0x624   : > { %v4066_v46 = vpop.eup %4065 }
 0x625   : > { %v1557_v47 = vsel %vm1224_vm4, %v4066_v46, 0.0 }
 0x626   : > { %1558 = vadd.xlane.f32.xlu1 %v1557_v47  ;;  %v3516_v47 = vld [vmem:[%s4279_s24] ss:$0 sm:$0xff] }
 0x628   : > { %v4068_v48 = vpop.eup %4067 }
 0x629   : > { %v1560_v49 = vsel %vm1224_vm4, %v4068_v48, 0.0 }
 0x62a   : > { %1561 = vadd.xlane.f32.xlu0 %v1560_v49 }
 0x637   : > { %1723 = vrot.lane.b32.xlu1 %v4498_v5, %s4805_s16  ;;  %v1892_v5 = vld [vmem:[%s4841_s8] sm:$0xff] }
 0x63b   : > { %1799 = vrot.lane.b32.xlu1 %v4502_v6, %s4805_s16  ;;  %v1893_v6 = vld [vmem:[%s4841_s8 + $0x8] sm:$0xff] }
 0x63c   : > { %v3914_v7 = vpack.c.bf16 %v1893_v6, %v1892_v5 }
 0x63e   : > { %3915 = vmatpush3.bf16.msra.mxu0 %v3914_v7 }
 0x63f   : > { %3916 = vmatprep.subr.bf16.mxu0 %v4202_v3 }
 0x640   : > { %1647 = vrot.lane.b32.xlu0 %v4494_v4, %s4805_s16  ;;  %s4811_s16 = smov 8  }
 0x642   : > { %3918 = vmatpush3.bf16.msra.mxu0 %v3917_v10 }
 0x643   : > { %3925 = vmatprep.subr.bf16.mxu0 %v4202_v3 }
 0x64e   : > { %v1553_v50 = vpop.xlane.xlu1 %1552 }
 0x64f   : > { %4069 = vrcp.f32 %v1553_v50  ;;  %v2099_v50 = vld [vmem:[%s4840_s12] sm:$0xff] }
 0x659   : > { %v4070_v51 = vpop.eup %4069 }
 0x65a   : > { %v1567_v52 = vmul.f32 %v4070_v51, %v4062_v32  ;;  %v2100_v51 = vld [vmem:[%s4840_s12 + $0x8] sm:$0xff] }
 0x65c   : > { %3722 = vmatmul.mubr.msk.f32.vlgmr.msra.gmra.mrb[10].mxu1 %vm1224_vm4, %v1567_v52  ;;  %v3926_v52 = vpack.c.bf16 %v2100_v51, %v2099_v50 }
 0x65d   : > { %3726 = vmatprep.mubr.msk.f32.mxu1 %vm4204_vm1, %v4205_v17 }
 0x6af   : > { %v1556_v53 = vpop.xlane.xlu0 %1555 }
 0x6b0   : > { %4071 = vrcp.f32 %v1556_v53  ;;  %v2101_v53 = vld [vmem:[%s4840_s12 + $0x10] sm:$0xff] }
 0x6b3   : > { %v1559_v54 = vpop.xlane.xlu1 %1558 }
 0x6b4   : > { %4073 = vrcp.f32 %v1559_v54  ;;  %v2102_v54 = vld [vmem:[%s4840_s12 + $0x18] sm:$0xff] }
 0x6b7   : > { %v1562_v55 = vpop.xlane.xlu0 %1561  ;;  %v1724_v58 = vpop.permute.xlu1 %1723 }
 0x6b8   : > { %4075 = vrcp.f32 %v1562_v55  ;;  %v3929_v55 = vpack.c.bf16 %v2102_v54, %v2101_v53 }
 0x6ba   : > { %v4072_v56 = vpop.eup %4071 }
 0x6bb   : > { %v1568_v57 = vmul.f32 %v4072_v56, %v4064_v44  ;;  %v1648_v59 = vpop.permute.xlu0 %1647  ;;  %v1800_v63 = vpop.permute.xlu1 %1799  ;;  %v2103_v56 = vld [vmem:[%s4840_s12 + $0x20] sm:$0xff] }
 0x6bc   : > { %3725 = vmatpush3.msra.mxu1 %v1648_v59  ;;  %v2105_v59 = vld [vmem:[%s4840_s12 + $0x30] sm:$0xff] }
 0x6bd   : > { %3727 = vmatmul.mubr.msk.f32.vlgmr.msra.gmra.mrb[12].mxu1 %vm1224_vm4, %v1568_v57  ;;  %3729 = vmatprep.subr.mxu1 %v4205_v17  ;;  %v2104_v57 = vld [vmem:[%s4840_s12 + $0x28] sm:$0xff] }
 0x6be   : > { %v4074_v60 = vpop.eup %4073  ;;  %3730 = vmatpush3.msra.mxu1 %v1724_v58  ;;  %3731 = vmatprep.mubr.msk.f32.mxu1 %vm4204_vm1, %v4205_v17  ;;  %v3932_v58 = vpack.c.bf16 %v2104_v57, %v2103_v56 }
 0x6bf   : > { %v1569_v61 = vmul.f32 %v4074_v60, %v4066_v46  ;;  %3734 = vmatprep.subr.mxu1 %v4205_v17  ;;  %v2106_v60 = vld [vmem:[%s4840_s12 + $0x38] sm:$0xff] }
 0x6c1   : > { %3732 = vmatmul.mubr.msk.f32.vlgmr.msra.gmra.mrb[14].mxu1 %vm1224_vm4, %v1569_v61  ;;  %v3935_v61 = vpack.c.bf16 %v2106_v60, %v2105_v59 }
 0x6c2   : > { %v4076_v0 = vpop.eup %4075  ;;  %3735 = vmatpush3.msra.mxu1 %v1800_v63  ;;  %3736 = vmatprep.mubr.msk.f32.mxu1 %vm4204_vm1, %v4205_v17 }
 0x6c3   : > { %v1570_v1 = vmul.f32 %v4076_v0, %v4068_v48  ;;  %3919 = vmatprep.subr.bf16.mxu1 %v4202_v3 }
 0x6c5   : > { %3737 = vmatmul.mubr.msk.f32.vlgmr.msra.gmra.mrb[16].mxu1 %vm1224_vm4, %v1570_v1 }
 0x6c6   : > { %3758 = vmatprep.mubr.msk.f32.mxu1 %vm4204_vm1, %v4205_v17  ;;  %3921 = vmatpush3.bf16.msra.mxu1 %v3920_v38 }
 0x6c7   : > { %3922 = vmatprep.subr.bf16.mxu1 %v4202_v3 }
 0x72f   : > { %v1643_v2 = vpop.f32.mrb[10].mxu1 }
 0x730   : > { %v3723_v4 = vpop.f32.mrb[11].mxu1 }
 0x790   : > { %v1719_v11 = vpop.f32.mrb[12].mxu1 }
 0x791   : > { %1876 = vrot.lane.b32.xlu0 %v1719_v11, %s4811_s16  ;;  %v3728_v12 = vpop.f32.mrb[13].mxu1  ;;  %s4850_s16 = sld [smem:[#allocation14_spill]] }
 0x794   : > { %v1795_v13 = vpop.f32.mrb[14].mxu1 }
 0x795   : > { %1880 = vrot.lane.b32.xlu1 %v1795_v13, %s4810_s15  ;;  %v3733_v14 = vpop.f32.mrb[15].mxu1  ;;  %s4849_s15 = sld [smem:[#allocation11_spill]] }
 0x798   : > { %v1871_v15 = vpop.f32.mrb[16].mxu1 }
 0x799   : > { %1884 = vrot.lane.b32.xlu0 %v1871_v15, %s4809_s26  ;;  %v3738_v16 = vpop.f32.mrb[17].mxu1  ;;  %s4848_s26 = sld [smem:[#allocation9_spill]] }
 0x79b   : > { %v3519_v13 = vld [vmem:[%s4849_s15] ss:$0 sm:$0xff]  ;;  %s4852_s15 = sld [smem:[#allocation13_spill]] }
 0x79f   : > { %v3517_v63 = vld [vmem:[%s4848_s26] ss:$0 sm:$0xff]  ;;  %s4851_s26 = sld [smem:[#allocation12_spill]] }
 0x7a1   : > { %v3522_v38 = vld [vmem:[%s4852_s15] ss:$0 sm:$0xff]  ;;  %s4857_s15 = smov 96  }
 0x7a5   : > { %v3521_v36 = vld [vmem:[%s4851_s26] ss:$0 sm:$0xff]  ;;  %s4856_s26 = smov 104  }
 0x803   : > { %v1877_v18 = vpop.permute.xlu0 %1876 }
 0x804   : > { %v1887_v21 = vsel %vm1224_vm4, %v1643_v2, %v1877_v18 }
 0x807   : > { %v1881_v20 = vpop.permute.xlu1 %1880 }
 0x808   : > { %v1889_v22 = vsel %vm1888_vm5, %v1887_v21, %v1881_v20 }
 0x80b   : > { %v1885_v23 = vpop.permute.xlu0 %1884 }
 0x80c   : > { %v1891_v24 = vsel %vm1890_vm6, %v1889_v22, %v1885_v23 }
 0x80d   : > { %3748 = vmatmul.mubr.msk.f32.vlgmr.msra.gmra.mrb[2].mxu0 %vm1093_vm3, %v1891_v24 }
 0x80e   : > { %3777 = vmatprep.mubr.msk.f32.mxu0 %vm4204_vm1, %v4205_v17  ;;  %3927 = vmatpush3.bf16.msra.mxu0 %v3926_v52 }
 0x80f   : > { %3928 = vmatprep.subr.bf16.mxu0 %v4202_v3 }
 0x812   : > { %3930 = vmatpush3.bf16.msra.mxu0 %v3929_v55 }
 0x813   : > { %3931 = vmatprep.subr.bf16.mxu0 %v4202_v3 }
 0x816   : > { %3933 = vmatpush3.bf16.msra.mxu0 %v3932_v58 }
 0x817   : > { %3934 = vmatprep.subr.bf16.mxu0 %v4202_v3 }
 0x81a   : > { %3936 = vmatpush3.bf16.msra.mxu0 %v3935_v61 }
 0x81b   : > { %3801 = vmatprep.subr.mxu0 %v4205_v17 }
 0x8e0   : > { %v1972_v26 = vpop.f32.mrb[2].mxu0 }
 0x8e1   : > { %v1973_v27 = vadd.f32 %v3513_v25, %v1972_v26  ;;  %v3749_v28 = vpop.f32.mrb[3].mxu0  ;;  %v2218_v26 = vld [vmem:[%s4850_s16] sm:$0xff] }
 0x8e3   : > { %v1976_v29 = vadd.f32 %v1973_v27, %v4483_v62  ;;  %v3923_v62 = vpack.c.bf16 %v2009_v40, %v2008_v39  ;;  %v2219_v27 = vld [vmem:[%s4850_s16 + $0x8] sm:$0xff] }
 0x8e4   : > { %v3938_v28 = vpack.c.bf16 %v2219_v27, %v2218_v26 }
 0x8e5   : > { %v1979_v30 = vsel %vm1093_vm3, %v1976_v29, 0.0  ;;  %3924 = vmatpush3.bf16.msra.mxu1 %v3923_v62  ;;  %v3523_v62 = vld [vmem:[%s4853_s10] ss:$0 sm:$0xff]  ;;  %s4860_s10 = smov 8  }
 0x8e6   : > { %1980 = vadd.xlane.f32.xlu1 %v1979_v30  ;;  %3937 = vmatprep.subr.bf16.mxu1 %v4202_v3  ;;  %v2221_v30 = vld [vmem:[%s4850_s16 + $0x18] sm:$0xff] }
 0x973   : > { %v1981_v31 = vpop.xlane.xlu1 %1980 }
 0x974   : > { %v1982_v32 = vmul.f32 0.03125, %v1981_v31 }
 0x976   : > { %v1983_v33 = vsub.f32 %v1976_v29, %v1982_v32  ;;  %v2220_v29 = vld [vmem:[%s4850_s16 + $0x10] sm:$0xff] }
 0x977   : > { %v3941_v31 = vpack.c.bf16 %v2221_v30, %v2220_v29 }
 0x978   : > { %v1984_v34 = vmul.f32 %v1983_v33, %v1983_v33 }
 0x97a   : > { %v1985_v35 = vsel %vm1093_vm3, %v1984_v34, 0.0 }
 0x97b   : > { %1986 = vadd.xlane.f32.xlu0 %v1985_v35 }
 0xa08   : > { %v1987_v41 = vpop.xlane.xlu0 %1986 }
 0xa09   : > { %v1988_v42 = vmul.f32 0.03125, %v1987_v41 }
 0xa0b   : > { %v1989_v43 = vadd.f32 1e-12, %v1988_v42 }
 0xa0d   : > { %4077 = vrsqrt.f32 %v1989_v43 }
 0xa17   : > { %v4078_v44 = vpop.eup %4077 }
 0xa18   : > { %v1991_v46 = vmul.f32 %v4078_v44, %v1983_v33 }
 0xa1a   : > { %v1998_v48 = vmul.f32 %v3515_v45, %v1991_v46 }
 0xa1c   : > { %v2005_v49 = vadd.f32 %v3516_v47, %v1998_v48 }
 0xa1e   : > { %3759 = vmatmul.mubr.msk.f32.vlgmr.msra.gmra.mrb[18].mxu1 %vm1093_vm3, %v2005_v49 }
 0xa1f   : > { %3788 = vmatprep.mubr.msk.f32.mxu1 %vm4204_vm1, %v4205_v17  ;;  %3939 = vmatpush3.bf16.msra.mxu1 %v3938_v28 }
 0xa20   : > { %3940 = vmatprep.subr.bf16.mxu1 %v4202_v3 }
 0xa23   : > { %3942 = vmatpush3.bf16.msra.mxu1 %v3941_v31 }
 0xa24   : > { %3791 = vmatprep.subr.mxu1 %v4205_v17 }
 0xaf1   : > { %v2086_v0 = vpop.f32.mrb[18].mxu1 }
 0xaf2   : > { %v2087_v1 = vadd.f32 %v3517_v63, %v2086_v0  ;;  %v3760_v2 = vpop.f32.mrb[19].mxu1 }
 0xaf4   : > { %v2090_v4 = vmul.f32 %v2087_v1, %v2087_v1 }
 0xaf6   : > { %v2091_v5 = vmul.f32 %v2090_v4, %v2087_v1 }
 0xaf8   : > { %v2092_v6 = vmul.f32 0.044715, %v2091_v5 }
 0xafa   : > { %v2093_v7 = vadd.f32 %v2092_v6, %v2087_v1 }
 0xafc   : > { %v2094_v8 = vmul.f32 0.7978846, %v2093_v7 }
 0xafe   : > { %4079 = vtanh.f32 %v2094_v8 }
 0xb08   : > { %v4080_v9 = vpop.eup %4079 }
 0xb09   : > { %v2096_v10 = vadd.f32 1.0, %v4080_v9 }
 0xb0b   : > { %v2097_v11 = vmul.f32 0.5, %v2096_v10 }
 0xb0d   : > { %v2098_v12 = vmul.f32 %v2097_v11, %v2087_v1 }
 0xb0f   : > { %3778 = vmatmul.mubr.msk.f32.vlgmr.msra.gmra.mrb[4].mxu0 %vm2114_vm7, %v2098_v12 }
 0xb10   : > { %3803 = vmatprep.mubr.msk.f32.mxu0 %vm4204_vm1, %v4205_v17 }
 0xbe2   : > { %v2184_v14 = vpop.f32.mrb[4].mxu0 }
 0xbe3   : > { %v2185_v15 = vadd.f32 %v3519_v13, %v2184_v14  ;;  %v3779_v16 = vpop.f32.mrb[5].mxu0 }
 0xbe5   : > { %v2188_v18 = vadd.f32 %v2185_v15, %v2005_v49 }
 0xbe7   : > { %v2191_v20 = vsel %vm1093_vm3, %v2188_v18, 0.0 }
 0xbe8   : > { %2192 = vadd.xlane.f32.xlu0 %v2191_v20 }
 0xc75   : > { %v2193_v21 = vpop.xlane.xlu0 %2192 }
 0xc76   : > { %v2194_v22 = vmul.f32 0.03125, %v2193_v21 }
 0xc78   : > { %v2195_v23 = vsub.f32 %v2188_v18, %v2194_v22 }
 0xc7a   : > { %v2196_v24 = vmul.f32 %v2195_v23, %v2195_v23 }
 0xc7c   : > { %v2197_v25 = vsel %vm1093_vm3, %v2196_v24, 0.0 }
 0xc7d   : > { %2198 = vadd.xlane.f32.xlu1 %v2197_v25 }
 0xd0a   : > { %v2199_v32 = vpop.xlane.xlu1 %2198 }
 0xd0b   : > { %v2200_v33 = vmul.f32 0.03125, %v2199_v32 }
 0xd0d   : > { %v2201_v34 = vadd.f32 1e-12, %v2200_v33 }
 0xd0f   : > { %4081 = vrsqrt.f32 %v2201_v34 }
 0xd19   : > { %v4082_v35 = vpop.eup %4081 }
 0xd1a   : > { %v2203_v37 = vmul.f32 %v4082_v35, %v2195_v23 }
 0xd1c   : > { %v2210_v39 = vmul.f32 %v3521_v36, %v2203_v37 }
 0xd1e   : > { %v4621_v40 = vadd.f32 %v3522_v38, %v2210_v39 }
 0xd20   : > { %3789 = vmatmul.mubr.msk.f32.vlgmr.msra.gmra.mrb[20].mxu1 %vm1093_vm3, %v4621_v40 }
 0xd21   : > { %3793 = vmatprep.mubr.msk.f32.mxu1 %vm4204_vm1, %v4205_v17 }
 0xdf3   : > { %v2298_v41 = vpop.f32.mrb[20].mxu1 }
 0xdf4   : > { %v2299_v42 = vadd.f32 %v3523_v62, %v2298_v41  ;;  %v3790_v43 = vpop.f32.mrb[21].mxu1 }
 0xdf6   : > { %2305 = vrot.lane.b32.xlu1 %v2299_v42, %s4854_s3  ;;  %2303 = vrot.lane.b32.xlu0 %v2299_v42, %s4855_s5  ;;  %s4858_s5 = smov 64   ;;  %s4859_s3 = sld [smem:[#allocation16_spill]] }
 0xdfa   : > { %2307 = vrot.lane.b32.xlu1 %v2299_v42, %s4856_s26  ;;  %2309 = vrot.lane.b32.xlu0 %v2299_v42, %s4857_s15  ;;  %s4861_s26 = sld [smem:[#allocation17_spill]] }
 0xdfc   : > { %v2977_v43 = vld [vmem:[%s4859_s3 + $0x8] sm:$0xff] }
 0xe68   : > { %v4632_v44 = vpop.permute.xlu1 %2305  ;;  %v4634_v45 = vpop.permute.xlu0 %2303 }
 0xe69   : > { %2461 = vrot.lane.b32.xlu0 %v4632_v44, %s4857_s15  ;;  %2385 = vrot.lane.b32.xlu1 %v4634_v45, %s4857_s15 }
 0xe6c   : > { %v4640_v46 = vpop.permute.xlu1 %2307  ;;  %v2310_v47 = vpop.permute.xlu0 %2309 }
 0xe6d   : > { %2537 = vrot.lane.b32.xlu1 %v4640_v46, %s4857_s15  ;;  %3792 = vmatpush3.xpose.msk.msra.mxu1 %vm1224_vm4, %v2310_v47  ;;  %v2978_v47 = vld [vmem:[%s4859_s3 + $0x10] sm:$0xff]  ;;  %s4862_s15 = smov 16  }
 0xe6e   : > { %3796 = vmatprep.subr.mxu1 %v4205_v17 }
 0xe70   : > { %3794 = vmatmul.mubr.msk.f32.vlgmr.msra.gmra.mrb[22].mxu1 %vm1224_vm4, %v2299_v42 }
 0xe71   : > { %3798 = vmatprep.mubr.msk.f32.mxu1 %vm4204_vm1, %v4205_v17 }
 0xedb   : > { %v2386_v48 = vpop.permute.xlu1 %2385  ;;  %v2462_v49 = vpop.permute.xlu0 %2461 }
 0xedc   : > { %3797 = vmatpush3.xpose.msk.msra.mxu1 %vm1224_vm4, %v2386_v48  ;;  %3802 = vmatpush3.xpose.msk.msra.mxu0 %vm1224_vm4, %v2462_v49  ;;  %v2979_v48 = vld [vmem:[%s4859_s3 + $0x18] sm:$0xff] }
 0xedd   : > { %3806 = vmatprep.subr.mxu1 %v4205_v17  ;;  %3811 = vmatprep.subr.mxu0 %v4205_v17  ;;  %v3947_v49 = vpack.c.bf16 %v2979_v48, %v2978_v47 }
 0xedf   : > { %v2538_v50 = vpop.permute.xlu1 %2537  ;;  %3799 = vmatmul.mubr.msk.f32.vlgmr.msra.gmra.mrb[24].mxu1 %vm1224_vm4, %v4634_v45  ;;  %3804 = vmatmul.mubr.msk.f32.vlgmr.msra.gmra.mrb[6].mxu0 %vm1224_vm4, %v4632_v44 }
 0xee0   : > { %3807 = vmatpush3.xpose.msk.msra.mxu1 %vm1224_vm4, %v2538_v50  ;;  %3808 = vmatprep.mubr.msk.f32.mxu1 %vm4204_vm1, %v4205_v17 }
 0xee1   : > { %3813 = vmatprep.mubr.msk.f32.mxu0 %vm4204_vm1, %v4205_v17  ;;  %3816 = vmatprep.subr.mxu1 %v4205_v17 }
 0xee3   : > { %3809 = vmatmul.mubr.msk.f32.vlgmr.msra.gmra.mrb[26].mxu1 %vm1224_vm4, %v4640_v46 }
 0xee4   : > { %3818 = vmatprep.mubr.msk.f32.mxu1 %vm4204_vm1, %v4205_v17 }
 0xf43   : > { %v2381_v51 = vpop.f32.mrb[22].mxu1 }
 0xf44   : > { %v2382_v52 = vadd.f32 %v2381_v51, %v4449_v19  ;;  %v3795_v53 = vpop.f32.mrb[23].mxu1 }
 0xf46   : > { %v2613_v54 = vsel %vm1224_vm4, %v2382_v52, -inf }
 0xf47   : > { %2614 = vmax.xlane.f32.xlu0 %v2613_v54 }
 0xfb2   : > { %v2457_v55 = vpop.f32.mrb[24].mxu1  ;;  %v2533_v56 = vpop.f32.mrb[6].mxu0 }
 0xfb3   : > { %v2458_v57 = vadd.f32 %v2457_v55, %v4449_v19  ;;  %v2534_v58 = vadd.f32 %v2533_v56, %v4449_v19  ;;  %v3800_v59 = vpop.f32.mrb[25].mxu1  ;;  %v3805_v60 = vpop.f32.mrb[7].mxu0 }
 0xfb5   : > { %v2616_v61 = vsel %vm1224_vm4, %v2458_v57, -inf  ;;  %v2619_v63 = vsel %vm1224_vm4, %v2534_v58, -inf }
 0xfb6   : > { %2617 = vmax.xlane.f32.xlu1 %v2616_v61  ;;  %v2609_v0 = vpop.f32.mrb[26].mxu1  ;;  %2620 = vmax.xlane.f32.xlu0 %v2619_v63  ;;  %v3537_v63 = vld [vmem:[%s4861_s26] ss:$0 sm:$0xff]  ;;  %s4866_s26 = sld [smem:[#allocation19_spill]] }
 0xfb7   : > { %v2610_v1 = vadd.f32 %v2609_v0, %v4449_v19  ;;  %v3810_v2 = vpop.f32.mrb[27].mxu1 }
 0xfb9   : > { %v2622_v4 = vsel %vm1224_vm4, %v2610_v1, -inf }
 0xfba   : > { %2623 = vmax.xlane.f32.xlu0 %v2622_v4 }
 0xfc7   : > { %2657 = vrot.lane.b32.xlu1 %v2299_v42, %s4858_s5  ;;  %v2976_v42 = vld [vmem:[%s4859_s3] sm:$0xff]  ;;  %s4864_s3 = sld [smem:[#allocation20_spill]] }
 0xfd4   : > { %v2615_v5 = vpop.xlane.xlu0 %2614 }
 0xfd5   : > { %v2625_v6 = vsub.f32 %v2382_v52, %v2615_v5 }
 0xfd7   : > { %v2629_v7 = vmul.f32 1.442695, %v2625_v6 }
 0xfd9   : > { %4083 = vpow2.f32 %v2629_v7 }
 0xfe3   : > { %v4084_v8 = vpop.eup %4083 }
 0xfe4   : > { %v2637_v9 = vsel %vm1224_vm4, %v4084_v8, 0.0 }
 0xfeb   : > { %2638 = vadd.xlane.f32.xlu1 %v2637_v9 }
0x1043   : > { %v2618_v10 = vpop.xlane.xlu1 %2617  ;;  %v2621_v11 = vpop.xlane.xlu0 %2620 }
0x1044   : > { %v2626_v12 = vsub.f32 %v2458_v57, %v2618_v10  ;;  %v2627_v13 = vsub.f32 %v2534_v58, %v2621_v11  ;;  %v3090_v11 = vld [vmem:[%s4864_s3] sm:$0xff] }
0x1046   : > { %v2631_v14 = vmul.f32 1.442695, %v2626_v12  ;;  %v2633_v19 = vmul.f32 1.442695, %v2627_v13  ;;  %v3091_v12 = vld [vmem:[%s4864_s3 + $0x8] sm:$0xff] }
0x1047   : > { %v2658_v15 = vpop.permute.xlu1 %2657  ;;  %v2624_v16 = vpop.xlane.xlu0 %2623  ;;  %v3950_v13 = vpack.c.bf16 %v3091_v12, %v3090_v11  ;;  %v3546_v11 = vld [vmem:[%s4871_s4] ss:$0 sm:$0xff] }
0x1048   : > { %4085 = vpow2.f32 %v2631_v14  ;;  %v2628_v18 = vsub.f32 %v2610_v1, %v2624_v16  ;;  %3812 = vmatpush3.msra.mxu0 %v2658_v15  ;;  %v3092_v14 = vld [vmem:[%s4864_s3 + $0x10] sm:$0xff] }
0x1049   : > { %4087 = vpow2.f32 %v2633_v19  ;;  %3821 = vmatprep.subr.mxu0 %v4205_v17  ;;  %v3093_v19 = vld [vmem:[%s4864_s3 + $0x18] sm:$0xff] }
0x104a   : > { %v2635_v20 = vmul.f32 1.442695, %v2628_v18 }
0x104c   : > { %4089 = vpow2.f32 %v2635_v20 }
0x1052   : > { %v4086_v21 = vpop.eup %4085 }
0x1053   : > { %v4088_v22 = vpop.eup %4087  ;;  %v2640_v23 = vsel %vm1224_vm4, %v4086_v21, 0.0 }
0x1054   : > { %2641 = vadd.xlane.f32.xlu0 %v2640_v23  ;;  %v2643_v24 = vsel %vm1224_vm4, %v4088_v22, 0.0  ;;  %v3540_v23 = vld [vmem:[%s4866_s26] ss:$0 sm:$0xff]  ;;  %s4870_s26 = sld [smem:[#allocation24_spill]] }
0x1055   : > { %2644 = vadd.xlane.f32.xlu1 %v2643_v24 }
0x1056   : > { %v4090_v25 = vpop.eup %4089 }
0x1057   : > { %v2646_v26 = vsel %vm1224_vm4, %v4090_v25, 0.0 }
0x1058   : > { %2647 = vadd.xlane.f32.xlu0 %v2646_v26 }
0x1066   : > { %2809 = vrot.lane.b32.xlu1 %v4632_v44, %s4858_s5  ;;  %v3944_v44 = vpack.c.bf16 %v2977_v43, %v2976_v42 }
0x106a   : > { %2885 = vrot.lane.b32.xlu1 %v4640_v46, %s4858_s5 }
0x106e   : > { %2733 = vrot.lane.b32.xlu0 %v4634_v45, %s4858_s5  ;;  %s4863_s5 = smov 24  }
0x1078   : > { %v2639_v27 = vpop.xlane.xlu1 %2638 }
0x1079   : > { %4091 = vrcp.f32 %v2639_v27 }
0x1083   : > { %v4092_v28 = vpop.eup %4091 }
0x1084   : > { %v2653_v29 = vmul.f32 %v4092_v28, %v4084_v8 }
0x1086   : > { %3814 = vmatmul.mubr.msk.f32.vlgmr.msra.gmra.mrb[8].mxu0 %vm1224_vm4, %v2653_v29 }
0x1087   : > { %3823 = vmatprep.mubr.msk.f32.mxu0 %vm4204_vm1, %v4205_v17 }
0x10e1   : > { %v2642_v30 = vpop.xlane.xlu0 %2641 }
0x10e2   : > { %v2645_v31 = vpop.xlane.xlu1 %2644  ;;  %4093 = vrcp.f32 %v2642_v30 }
0x10e3   : > { %4095 = vrcp.f32 %v2645_v31 }
0x10e5   : > { %v2648_v32 = vpop.xlane.xlu0 %2647 }
0x10e6   : > { %v2810_v33 = vpop.permute.xlu1 %2809  ;;  %4097 = vrcp.f32 %v2648_v32 }
0x10e7   : > { %3822 = vmatpush3.msra.mxu0 %v2810_v33 }
0x10e8   : > { %3943 = vmatprep.subr.bf16.mxu0 %v4202_v3 }
0x10e9   : > { %v2734_v34 = vpop.permute.xlu0 %2733 }
0x10ea   : > { %3817 = vmatpush3.msra.mxu1 %v2734_v34  ;;  %v2886_v39 = vpop.permute.xlu1 %2885 }
0x10eb   : > { %3826 = vmatprep.subr.mxu1 %v4205_v17 }
0x10ec   : > { %v4094_v35 = vpop.eup %4093 }
0x10ed   : > { %v4096_v36 = vpop.eup %4095  ;;  %v2654_v37 = vmul.f32 %v4094_v35, %v4086_v21 }
0x10ee   : > { %v2655_v38 = vmul.f32 %v4096_v36, %v4088_v22 }
0x10ef   : > { %3819 = vmatmul.mubr.msk.f32.vlgmr.msra.gmra.mrb[28].mxu1 %vm1224_vm4, %v2654_v37 }
0x10f0   : > { %v4098_v62 = vpop.eup %4097  ;;  %3824 = vmatmul.mubr.msk.f32.vlgmr.msra.gmra.mrb[10].mxu0 %vm1224_vm4, %v2655_v38  ;;  %3827 = vmatpush3.msra.mxu1 %v2886_v39 }
0x10f1   : > { %v2656_v41 = vmul.f32 %v4098_v62, %v4090_v25  ;;  %3828 = vmatprep.mubr.msk.f32.mxu1 %vm4204_vm1, %v4205_v17  ;;  %3839 = vmatprep.mubr.msk.f32.mxu0 %vm4204_vm1, %v4205_v17 }
0x10f2   : > { %3949 = vmatprep.subr.bf16.mxu1 %v4202_v3  ;;  %3945 = vmatpush3.bf16.msra.mxu0 %v3944_v44 }
0x10f3   : > { %3829 = vmatmul.mubr.msk.f32.vlgmr.msra.gmra.mrb[30].mxu1 %vm1224_vm4, %v2656_v41  ;;  %3946 = vmatprep.subr.bf16.mxu0 %v4202_v3 }
0x10f4   : > { %3850 = vmatprep.mubr.msk.f32.mxu1 %vm4204_vm1, %v4205_v17  ;;  %3951 = vmatpush3.bf16.msra.mxu1 %v3950_v13 }
0x10f5   : > { %3952 = vmatprep.subr.bf16.mxu1 %v4202_v3 }
0x10f6   : > { %3948 = vmatpush3.bf16.msra.mxu0 %v3947_v49 }
0x10f7   : > { %3955 = vmatprep.subr.bf16.mxu0 %v4202_v3 }
0x1159   : > { %v2729_v45 = vpop.f32.mrb[8].mxu0 }
0x115a   : > { %v3815_v46 = vpop.f32.mrb[9].mxu0 }
0x11c2   : > { %v2805_v50 = vpop.f32.mrb[28].mxu1 }
0x11c3   : > { %v2881_v51 = vpop.f32.mrb[10].mxu0  ;;  %2962 = vrot.lane.b32.xlu0 %v2805_v50, %s4860_s10  ;;  %v3820_v52 = vpop.f32.mrb[29].mxu1  ;;  %s4865_s10 = sld [smem:[#allocation18_spill]] }
0x11c4   : > { %2966 = vrot.lane.b32.xlu1 %v2881_v51, %s4862_s15  ;;  %v3825_v53 = vpop.f32.mrb[11].mxu0  ;;  %s4867_s15 = sld [smem:[#allocation22_spill]] }
0x11c6   : > { %v2957_v54 = vpop.f32.mrb[30].mxu1 }
0x11c7   : > { %2970 = vrot.lane.b32.xlu0 %v2957_v54, %s4863_s5  ;;  %v3830_v55 = vpop.f32.mrb[31].mxu1  ;;  %s4868_s5 = sld [smem:[#allocation21_spill]] }
0x11c9   : > { %v3539_v21 = vld [vmem:[%s4865_s10] ss:$0 sm:$0xff]  ;;  %s4869_s10 = sld [smem:[#allocation23_spill]] }
0x11ca   : > { %v3183_v26 = vld [vmem:[%s4867_s15] sm:$0xff]  ;;  %v3184_v27 = vld [vmem:[%s4867_s15 + $0x8] sm:$0xff]  ;;  %v3185_v29 = vld [vmem:[%s4867_s15 + $0x10] sm:$0xff] }
0x11cb   : > { %v3956_v28 = vpack.c.bf16 %v3184_v27, %v3183_v26  ;;  %v3186_v30 = vld [vmem:[%s4867_s15 + $0x18] sm:$0xff]  ;;  %v3187_v32 = vld [vmem:[%s4867_s15 + $0x20] sm:$0xff]  ;;  %v3188_v33 = vld [vmem:[%s4867_s15 + $0x28] sm:$0xff] }
0x11cc   : > { %v3959_v31 = vpack.c.bf16 %v3186_v30, %v3185_v29  ;;  %v3962_v34 = vpack.c.bf16 %v3188_v33, %v3187_v32  ;;  %v3190_v35 = vld [vmem:[%s4867_s15 + $0x38] sm:$0xff] }
0x11cd   : > { %v3541_v37 = vld [vmem:[%s4868_s5] ss:$0 sm:$0xff]  ;;  %s986_s5 = sand.u32 1, %s4159_s1  }
0x11ce   : > { %s987_s3 = scalar_lea.vmem [#allocation2], %s986_s5 }
0x11cf   : > { %v3543_v50 = vld [vmem:[%s4869_s10] ss:$0 sm:$0xff]  ;;  %s3548_s10 = sshll.u32 %s4407_s0, 4  ;;  %s4215_s0 = smov [#allocation2]  }
0x11d0   : > { %s4760_s8 = scalar_lea.hbm %s4384_s27, %s3548_s10  ;;  %s4109_s9 = sshll.u32 %s4215_s0, 4  ;;  %s4110_s9 = int_to_ptr.vmem [resolvable:$false] %s4109_s9 }
0x11d1   : > { %s4111_s12 = scalar_lea.vmem %s4110_s9, 32 }
0x1235   : > { %v2963_v56 = vpop.permute.xlu0 %2962 }
0x1236   : > { %v2973_v57 = vsel %vm1224_vm4, %v2729_v45, %v2963_v56  ;;  %v2967_v58 = vpop.permute.xlu1 %2966 }
0x1237   : > { %v2974_v59 = vsel %vm1888_vm5, %v2973_v57, %v2967_v58 }
0x1239   : > { %v2971_v60 = vpop.permute.xlu0 %2970 }
0x123a   : > { %v2975_v61 = vsel %vm1890_vm6, %v2974_v59, %v2971_v60 }
0x123b   : > { %3840 = vmatmul.mubr.msk.f32.vlgmr.msra.gmra.mrb[12].mxu0 %vm1093_vm3, %v2975_v61  ;;  %v3301_v61 = vld [vmem:[%s4842_s6] sm:$0xff] }
0x123c   : > { %3869 = vmatprep.mubr.msk.f32.mxu0 %vm4204_vm1, %v4205_v17  ;;  %3957 = vmatpush3.bf16.msra.mxu0 %v3956_v28 }
0x123d   : > { %3958 = vmatprep.subr.bf16.mxu0 %v4202_v3 }
0x1240   : > { %3960 = vmatpush3.bf16.msra.mxu0 %v3959_v31 }
0x1241   : > { %3961 = vmatprep.subr.bf16.mxu0 %v4202_v3 }
0x1244   : > { %3963 = vmatpush3.bf16.msra.mxu0 %v3962_v34 }
0x1245   : > { %3964 = vmatprep.subr.bf16.mxu0 %v4202_v3 }
0x130e   : > { %v3056_v0 = vpop.f32.mrb[12].mxu0 }
0x130f   : > { %v3057_v1 = vadd.f32 %v3537_v63, %v3056_v0  ;;  %v3841_v2 = vpop.f32.mrb[13].mxu0  ;;  %v3302_v63 = vld [vmem:[%s4842_s6 + $0x8] sm:$0xff] }
0x1310   : > { %v3968_v0 = vpack.c.bf16 %v3302_v63, %v3301_v61  ;;  %v3304_v2 = vld [vmem:[%s4842_s6 + $0x18] sm:$0xff] }
0x1311   : > { %v3060_v4 = vadd.f32 %v3057_v1, %v4621_v40  ;;  %v3953_v40 = vpack.c.bf16 %v3093_v19, %v3092_v14  ;;  %v3303_v1 = vld [vmem:[%s4842_s6 + $0x10] sm:$0xff]  ;;  %s3394_s6 = sshll.u32 %s987_s3, 4  ;;  %s4762_s6 = int_to_ptr.vmem [resolvable:$true] %s3394_s6 }
0x1312   : > { %s4105_s4 = scalar_lea.vmem %s4762_s6, 16  ;;  %p4112_p0 = scmp.lt.s32.totalorder %s4762_s6, %s4110_s9 }
0x1313   : > { %v3063_v5 = vsel %vm1093_vm3, %v3060_v4, 0.0  ;;  %3954 = vmatpush3.bf16.msra.mxu1 %v3953_v40  ;;  %p4106_p11 = scmp.ne.s32.totalorder %s4762_s6, %s4105_s4  ;;  %p4113_p1 = scmp.lt.s32.totalorder %s4111_s12, %s4105_s4 }
0x1314   : > { %3064 = vadd.xlane.f32.xlu1 %v3063_v5  ;;  %3967 = vmatprep.subr.bf16.mxu1 %v4202_v3 }
0x1315   : > { %p4107_p12 = pnand %p4106_p11, %p4424_p5  ;;  %p4114_p2 = por %p4113_p1, %p4112_p0 }
0x1317   : > { %p4108_p13 = pneg %p4107_p12 }
0x1319   : > { %p4115_p3 = pnand %p4114_p2, %p4108_p13 }
0x13a1   : > { %v3065_v6 = vpop.xlane.xlu1 %3064 }
0x13a2   : > { %v3066_v7 = vmul.f32 0.03125, %v3065_v6 }
0x13a4   : > { %v3067_v8 = vsub.f32 %v3060_v4, %v3066_v7  ;;  %v3971_v4 = vpack.c.bf16 %v3304_v2, %v3303_v1 }
0x13a6   : > { %v3068_v9 = vmul.f32 %v3067_v8, %v3067_v8 }
0x13a8   : > { %v3069_v10 = vsel %vm1093_vm3, %v3068_v9, 0.0  ;;  %v3545_v9 = vld [vmem:[%s4870_s26] ss:$0 sm:$0xff]  ;;  %s3382_s26 = scalar_lea.sflag [#allocation3], %s986_s5 }
0x13a9   : > { %3070 = vadd.xlane.f32.xlu0 %v3069_v10 }
0x1436   : > { %v3071_v15 = vpop.xlane.xlu0 %3070 }
0x1437   : > { %v3072_v16 = vmul.f32 0.03125, %v3071_v15 }
0x1439   : > { %v3073_v18 = vadd.f32 1e-12, %v3072_v16 }
0x143b   : > { %4099 = vrsqrt.f32 %v3073_v18 }
0x1445   : > { %v4100_v20 = vpop.eup %4099 }
0x1446   : > { %v3075_v22 = vmul.f32 %v4100_v20, %v3067_v8 }
0x1448   : > { %v3082_v24 = vmul.f32 %v3539_v21, %v3075_v22 }
0x144a   : > { %v3089_v25 = vadd.f32 %v3540_v23, %v3082_v24 }
0x144c   : > { %3851 = vmatmul.mubr.msk.f32.vlgmr.msra.gmra.mrb[32].mxu1 %vm1093_vm3, %v3089_v25 }
0x144d   : > { %3880 = vmatprep.mubr.msk.f32.mxu1 %vm4204_vm1, %v4205_v17  ;;  %v3189_v17 = vld [vmem:[%s4867_s15 + $0x30] sm:$0xff]  ;;  %3969 = vmatpush3.bf16.msra.mxu1 %v3968_v0 }
0x144e   : > { %v3965_v36 = vpack.c.bf16 %v3190_v35, %v3189_v17  ;;  %3970 = vmatprep.subr.bf16.mxu1 %v4202_v3  ;;  %v3305_v3 = vld [vmem:[%s4379_s20] sm:$0x1] }
0x1450   : > { %3966 = vmatpush3.bf16.msra.mxu0 %v3965_v36 }
0x1451   : > { %3972 = vmatpush3.bf16.msra.mxu1 %v3971_v4 }
0x151f   : > { %v3170_v38 = vpop.f32.mrb[32].mxu1 }
0x1520   : > { %v3171_v39 = vadd.f32 %v3541_v37, %v3170_v38  ;;  %v3852_v62 = vpop.f32.mrb[33].mxu1 }
0x1522   : > { %v3174_v41 = vmul.f32 %v3171_v39, %v3171_v39 }
0x1524   : > { %v3175_v42 = vmul.f32 %v3174_v41, %v3171_v39 }
0x1526   : > { %v3176_v43 = vmul.f32 0.044715, %v3175_v42 }
0x1528   : > { %v3177_v44 = vadd.f32 %v3176_v43, %v3171_v39 }
0x152a   : > { %v3178_v45 = vmul.f32 0.7978846, %v3177_v44 }
0x152c   : > { %4101 = vtanh.f32 %v3178_v45 }
0x1536   : > { %v4102_v46 = vpop.eup %4101 }
0x1537   : > { %v3180_v47 = vadd.f32 1.0, %v4102_v46 }
0x1539   : > { %v3181_v48 = vmul.f32 0.5, %v3180_v47 }
0x153b   : > { %v3182_v49 = vmul.f32 %v3181_v48, %v3171_v39 }
0x153d   : > { %3870 = vmatmul.mubr.msk.f32.vlgmr.msra.gmra.mrb[14].mxu0 %vm2114_vm7, %v3182_v49 }
0x1610   : > { %v3267_v51 = vpop.f32.mrb[14].mxu0 }
0x1611   : > { %v3268_v52 = vadd.f32 %v3543_v50, %v3267_v51  ;;  %v3871_v53 = vpop.f32.mrb[15].mxu0 }
0x1613   : > { %v3271_v54 = vadd.f32 %v3268_v52, %v3089_v25 }
0x1615   : > { %v3274_v55 = vsel %vm1093_vm3, %v3271_v54, 0.0 }
0x1616   : > { %3275 = vadd.xlane.f32.xlu0 %v3274_v55 }
0x16a3   : > { %v3276_v56 = vpop.xlane.xlu0 %3275 }
0x16a4   : > { %v3277_v57 = vmul.f32 0.03125, %v3276_v56 }
0x16a6   : > { %v3278_v58 = vsub.f32 %v3271_v54, %v3277_v57 }
0x16a8   : > { %v3279_v59 = vmul.f32 %v3278_v58, %v3278_v58 }
0x16aa   : > { %v3280_v60 = vsel %vm1093_vm3, %v3279_v59, 0.0 }
0x16ab   : > { %3281 = vadd.xlane.f32.xlu1 %v3280_v60 }
0x1738   : > { %v3282_v5 = vpop.xlane.xlu1 %3281 }
0x1739   : > { %v3283_v6 = vmul.f32 0.03125, %v3282_v5 }
0x173b   : > { %v3284_v7 = vadd.f32 1e-12, %v3283_v6 }
0x173d   : > { %4103 = vrsqrt.f32 %v3284_v7 }
0x1747   : > { %v4104_v8 = vpop.eup %4103 }
0x1748   : > { %v3286_v10 = vmul.f32 %v4104_v8, %v3278_v58 }
0x174a   : > { %v3293_v12 = vmul.f32 %v3545_v9, %v3286_v10 }
0x174c   : > { %v3300_v13 = vadd.f32 %v3546_v11, %v3293_v12 }
0x174e   : > { %3881 = vmatmul.mubr.msk.f32.vlgmr.msra.gmra.mrb[34].mxu1 %vm1093_vm3, %v3300_v13 }
0x1821   : > { %v3375_v14 = vpop.f32.mrb[34].mxu1 }
0x1822   : > { %v3376_v19 = vadd.f32 %v3375_v14, %v3305_v3  ;;  %v3882_v40 = vpop.f32.mrb[35].mxu1 }
0x1824   : > { %3380 = vst.msk [vmem:[%s987_s3] sm:$0x1] %vm3379_vm8, %v3376_v19 }
0x1825   : > { %4118 = shalt.err (!%p4115_p3)
}
0x1826   : > { %s4119_s3 = scalar_lea.hbm %s4760_s8, 16  ;;  %s4123_s5 = scalar_lea.hbm %s4384_s27, 32 }
0x1827   : > { %p4120_p4 = scmp.ne.s32.totalorder %s4760_s8, %s4119_s3  ;;  %p4124_p9 = scmp.lt.u32.totalorder %s4760_s8, %s4384_s27 }
0x1828   : > { %p4125_p10 = scmp.lt.u32.totalorder %s4123_s5, %s4119_s3  ;;  %p4127_p12 = scmp.lt.u32.totalorder %s4119_s3, %s4760_s8 }
0x1829   : > { %p4121_p7 = pnand %p4120_p4, %p4424_p5 }
0x182a   : > { %p4126_p11 = por %p4125_p10, %p4124_p9 }
0x182b   : > { %p4122_p8 = pneg %p4121_p7 }
0x182c   : > { %p4128_p0 = por %p4127_p12, %p4126_p11 }
0x182e   : > { %p4129_p13 = pnand %p4128_p0, %p4122_p8 }
0x1830   : > { %4132 = shalt.err (!%p4129_p13)
}
0x1831   : > { %3973 = dma.vmem_to_hbm [thread:$0]  (%p4424_p5), %s4762_s6, 16, %s4760_s8, %s3382_s26  }
0x1832 PF: > { %p3979_p1 = scmp.ge.s32.totalorder %s4167_s7, 2  ;;  %s3406_s9 = sand.u32 1, %s4155_s28  }
0x1833   : > { %s3407_s12 = scalar_lea.sflag [#allocation3], %s3406_s9 }
0x1834   : > { %p3976_p2 = pnand %p3979_p1, %p4428_p6 }
0x1836   : > { %4150 = dma.done.wait (!%p3976_p2), %s3407_s12, 16  }
0x1837   : > { %4152 = vsyncadd (!%p3976_p2), %s3407_s12, 4294967280  ;;  %p75_p3 = scmp.ge.s32.totalorder %s4411_s11, 4   ;;  %s4872_s28 = smov %s4159_s1 }
0x1838   : > { %s4873_s1 = smov %s4163_s2  ;;  %s4874_s2 = smov %s4422_s18 }
0x1839   : > { %s4875_s7 = smov %s4411_s11  ;;  %77 = sbr.rel (!%p75_p3) target bundleno = 69 (0x45), region = 218 }
0x1840   :  { %3411 = vsyncpa [#allocation3], 1 }
0x1841   :  { %3413 = vsyncpa [#allocation3 + $0x1], 1 }

</bundles_post_ra>
